<compile_context>
chip_gen: v7x
topology: tpu7x:2x2x1
jax: 0.10.0
libtpu: 0.0.40
codegen_flags: <defaults>
</compile_context>

<pallas_src>
import functools

import jax
import jax.numpy as jnp
from jax import lax
from jax.experimental import pallas as pl
from jax.experimental.pallas import tpu as pltpu


# ----------------------------------------------------------------------------
# Fused kernel: per (batch, Q-tile, K-tile) step; online softmax over K tiles,
# fc_out epilogue on the last K step.
# ----------------------------------------------------------------------------
def _fused_attn_kernel(q_ref, k_ref, v_ref, mask_ref, wt_ref, b_ref,
                       out_ref, *rest,
                       heads, head_dim, compute_dtype, return_attn):
    if return_attn:
        attn_ref = rest[0]
        m_sc, l_sc, acc_sc = rest[1:]
    else:
        attn_ref = None
        m_sc, l_sc, acc_sc = rest

    ki = pl.program_id(2)
    num_k = pl.num_programs(2)

    @pl.when(ki == 0)
    def _():
        m_sc[...] = jnp.full(m_sc.shape, -jnp.inf, m_sc.dtype)
        l_sc[...] = jnp.zeros(l_sc.shape, l_sc.dtype)
        acc_sc[...] = jnp.zeros(acc_sc.shape, acc_sc.dtype)

    q = q_ref[0]                                       # (tq, E) bf16, pre-scaled
    k = k_ref[0]                                       # (tk, E) bf16
    v = v_ref[0]                                       # (tk, E) bf16
    # int8 mask -> i32 compare; hoisted out of the head loop (reused H times).
    neg_mask = mask_ref[0].astype(jnp.int32) == 0      # (tq, tk) bool
    neg = jnp.float32(-1e20)

    for h in range(heads):                             # static unroll over heads
        sl = slice(h * head_dim, (h + 1) * head_dim)
        # scores = (q*scale) @ k^T for this head (contract on D, no transpose)
        s = lax.dot_general(q[:, sl], k[:, sl], (((1,), (1,)), ((), ())),
                            preferred_element_type=jnp.float32)       # (tq, tk)
        s = jnp.where(neg_mask, neg, s)                # masked_fill semantics

        m_prev = m_sc[h]                               # (tq, 1)
        m_new = jnp.maximum(m_prev, jnp.max(s, axis=-1, keepdims=True))
        alpha = jnp.exp(m_prev - m_new)                # (tq, 1)
        p = jnp.exp(s - m_new)                         # (tq, tk)
        l_new = alpha * l_sc[h] + jnp.sum(p, axis=-1, keepdims=True)
        l_sc[h] = l_new
        acc_sc[h] = alpha * acc_sc[h] + jnp.dot(
            p.astype(compute_dtype), v[:, sl],
            preferred_element_type=jnp.float32)        # (tq, D)
        m_sc[h] = m_new

        if attn_ref is not None:
            # Only reachable with a single K step (enforced by the wrapper), so
            # p / l_new is the full softmax row.  EUP reciprocal, not VALU.
            attn_ref[0, h] = (p * pl.reciprocal(l_new, approx=True)
                              ).astype(attn_ref.dtype)

    @pl.when(ki == num_k - 1)
    def _():
        # fc_out epilogue: out = sum_h (acc_h / l_h) @ W^T[h*D:(h+1)*D, :] + b
        out = jnp.zeros(out_ref.shape[1:], jnp.float32)        # (tq, E)
        for h in range(heads):
            ctx_h = acc_sc[h] * pl.reciprocal(l_sc[h], approx=True)   # (tq, D)
            out = out + jnp.dot(ctx_h.astype(compute_dtype), wt_ref[h],
                                preferred_element_type=jnp.float32)   # (tq, E)
        out_ref[0] = out + b_ref[...]


# ----------------------------------------------------------------------------
# Wrapper: bf16 operands cast once, flash K tiling, explicit VMEM budget.
# ----------------------------------------------------------------------------
def self_attention_forward(values, keys, query, mask, params, embed_size,
                           heads, *, block_q=256, block_k=512,
                           return_attn=False, compute_dtype=jnp.bfloat16,
                           attn_dtype=jnp.bfloat16):
    # block_q: 256 fills the 256-wide MXU on v6e/v7x; use 128 on v5e.
    N, q_len, E = query.shape
    k_len = keys.shape[1]
    assert E == embed_size
    assert values.shape[1] == k_len, "value_len must equal key_len"
    head_dim = embed_size // heads
    assert head_dim * heads == embed_size
    scale = 1.0 / (float(embed_size) ** 0.5)

    tq = q_len if q_len <= block_q else block_q
    assert q_len % tq == 0, "query length must be divisible by the Q tile"
    # Returning the full attention matrix forces a whole K row per step.
    tk = k_len if (return_attn or k_len <= block_k) else block_k
    assert k_len % tk == 0, "key length must be divisible by the K tile"
    num_k = k_len // tk

    # mask -> (N, Q, K) int8 (4x fewer HBM bytes); head dim must be broadcast 1.
    if mask.ndim == 4:
        assert mask.shape[1] == 1, "per-head masks are not supported"
        mask_nqk = mask[:, 0]
    else:
        mask_nqk = mask
    assert mask_nqk.shape == (N, q_len, k_len)
    mask_nqk = (mask_nqk != 0).astype(jnp.int8)

    # Cast the big operands to bf16 ONCE.  The 1/sqrt(E) scale is folded into
    # q's existing cast op (fuses into the same elementwise XLA op -> no extra
    # HBM pass, keeps f32 scale precision, removes per-head score scaling).
    q_in = (query * scale).astype(compute_dtype)
    k_in = keys.astype(compute_dtype)
    v_in = values.astype(compute_dtype)
    # fc_out contracts x @ W^T; pre-reshape W^T to (heads, D, E) once (tiny op)
    # so the epilogue indexes whole per-head blocks (no unaligned lane writes).
    wt = params["fc_out_w"].T.reshape(heads, head_dim, E).astype(compute_dtype)
    b = params["fc_out_b"].reshape(1, E).astype(jnp.float32)  # E floats; f32 ok

    const_pipe = dict(pipeline_mode=pl.Buffered(1))   # block index never moves
    kv_pipe = const_pipe if num_k == 1 else {}        # pipeline K/V when tiled

    in_specs = [
        pl.BlockSpec((1, tq, E), lambda n, qi, ki: (n, qi, 0)),             # q
        pl.BlockSpec((1, tk, E), lambda n, qi, ki: (n, ki, 0), **kv_pipe),  # k
        pl.BlockSpec((1, tk, E), lambda n, qi, ki: (n, ki, 0), **kv_pipe),  # v
        pl.BlockSpec((1, tq, tk), lambda n, qi, ki: (n, qi, ki)),           # mask
        pl.BlockSpec((heads, head_dim, E), lambda n, qi, ki: (0, 0, 0),
                     **const_pipe),                                         # W^T
        pl.BlockSpec((1, E), lambda n, qi, ki: (0, 0), **const_pipe),       # bias
    ]
    out_shapes = [jax.ShapeDtypeStruct((N, q_len, E), jnp.float32)]
    out_specs = [pl.BlockSpec((1, tq, E), lambda n, qi, ki: (n, qi, 0))]
    if return_attn:
        out_shapes.append(
            jax.ShapeDtypeStruct((N, heads, q_len, k_len), attn_dtype))
        out_specs.append(
            pl.BlockSpec((1, heads, tq, k_len), lambda n, qi, ki: (n, 0, qi, 0)))

    scratch_shapes = [
        pltpu.VMEM((heads, tq, 1), jnp.float32),          # running max m
        pltpu.VMEM((heads, tq, 1), jnp.float32),          # running denom l
        pltpu.VMEM((heads, tq, head_dim), jnp.float32),   # per-head context acc
    ]

    # Explicit scoped-VMEM budget from the working set (+ headroom), clamped
    # under the smallest physical VMEM (v7x: 64 MiB).
    csz = jnp.dtype(compute_dtype).itemsize
    kv_bufs = 1 if num_k == 1 else 2
    ws = (2 * tq * E * csz                        # q (double-buffered)
          + 2 * kv_bufs * tk * E * csz            # k + v
          + 2 * tq * tk                           # mask (int8)
          + heads * head_dim * E * csz            # W^T (single-buffered)
          + E * 4                                 # bias
          + 2 * tq * E * 4                        # out (f32)
          + heads * tq * (2 * 128 + max(head_dim, 128)) * 4)   # scratch (padded)
    if return_attn:
        ws += 2 * heads * tq * k_len * jnp.dtype(attn_dtype).itemsize
    vmem_limit = int(min(max(16 << 20, 2 * ws + (2 << 20)), 60 << 20))

    kernel = functools.partial(_fused_attn_kernel, heads=heads,
                               head_dim=head_dim, compute_dtype=compute_dtype,
                               return_attn=return_attn)

    results = pl.pallas_call(
        kernel,
        out_shape=tuple(out_shapes),
        grid_spec=pltpu.PrefetchScalarGridSpec(
            num_scalar_prefetch=0,
            grid=(N, q_len // tq, num_k),
            in_specs=in_specs,
            out_specs=out_specs,
            scratch_shapes=scratch_shapes),
        compiler_params=pltpu.CompilerParams(
            dimension_semantics=("parallel",
                                 "parallel" if N == 1 else "arbitrary",
                                 "arbitrary"),
            vmem_limit_bytes=vmem_limit),
    )(q_in, k_in, v_in, mask_nqk, wt, b)

    if return_attn:
        out, attn = results
        return out, attn
    (out,) = results
    return out, None


# ----------------------------------------------------------------------------
# Params + pure-JAX reference (mirrors the PyTorch forward, f32)
# ----------------------------------------------------------------------------
def init_params(key, embed_size, heads):
    head_dim = embed_size // heads
    k1, k2, k3, k4, k5 = jax.random.split(key, 5)
    # q/k/v projection weights exist in __init__ but are UNUSED by forward().
    return {
        "values_w": jax.random.normal(k1, (head_dim, head_dim), jnp.float32) * 0.1,
        "keys_w": jax.random.normal(k2, (head_dim, head_dim), jnp.float32) * 0.1,
        "queries_w": jax.random.normal(k3, (head_dim, head_dim), jnp.float32) * 0.1,
        "fc_out_w": jax.random.normal(k4, (embed_size, embed_size), jnp.float32) * 0.1,
        "fc_out_b": jax.random.normal(k5, (embed_size,), jnp.float32) * 0.1,
    }


def reference_forward(values, keys, query, mask, params, embed_size, heads):
    N, query_len, _ = query.shape
    head_dim = embed_size // heads
    v = values.reshape(N, values.shape[1], heads, head_dim)
    k = keys.reshape(N, keys.shape[1], heads, head_dim)
    q = query.reshape(N, query_len, heads, head_dim)
    energy = jnp.einsum("nqhd,nkhd->nhqk", q, k)
    energy = jnp.where(mask == 0, jnp.float32(-1e20), energy)
    attn = jax.nn.softmax(energy / (embed_size ** 0.5), axis=3)
    out = jnp.einsum("nhql,nlhd->nqhd", attn, v).reshape(N, query_len, heads * head_dim)
    out = out @ params["fc_out_w"].T + params["fc_out_b"]
    return out, attn


if __name__ == "__main__":
    embed_size, heads = 32, 4

    key = jax.random.PRNGKey(0)
    kp, kv_, kk, kq = jax.random.split(key, 4)
    params = init_params(kp, embed_size, heads)

    # --- Case 1: module-faithful call (returns the attention matrix) --------
    N, seq = 2, 8
    values = jax.random.normal(kv_, (N, seq, embed_size), jnp.float32)
    keys_in = jax.random.normal(kk, (N, seq, embed_size), jnp.float32)
    query = jax.random.normal(kq, (N, seq, embed_size), jnp.float32)
    causal = jnp.tril(jnp.ones((seq, seq), jnp.int8))
    mask = jnp.broadcast_to(causal, (N, 1, seq, seq))

    out, attn = self_attention_forward(values, keys_in, query, mask, params,
                                       embed_size, heads, return_attn=True)
    out = jax.block_until_ready(out)
    attn = jax.block_until_ready(attn)

    out_ref, attn_ref = reference_forward(values, keys_in, query, mask, params,
                                          embed_size, heads)
    assert out.shape == (N, seq, embed_size)
    assert attn.shape == (N, heads, seq, seq)
    # bf16 MXU inputs / bf16 attention output -> looser tolerances vs f32 ref.
    assert jnp.allclose(out, out_ref, atol=5e-2, rtol=5e-2)
    assert jnp.allclose(attn.astype(jnp.float32), attn_ref, atol=2e-2, rtol=2e-2)

    # --- Case 2: flash-tiled K axis (return_attn=False, multiple K/Q tiles) -
    N2, seq2 = 2, 256
    k2v, k2k, k2q = jax.random.split(jax.random.PRNGKey(1), 3)
    values2 = jax.random.normal(k2v, (N2, seq2, embed_size), jnp.float32)
    keys2 = jax.random.normal(k2k, (N2, seq2, embed_size), jnp.float32)
    query2 = jax.random.normal(k2q, (N2, seq2, embed_size), jnp.float32)
    causal2 = jnp.tril(jnp.ones((seq2, seq2), jnp.int8))
    mask2 = jnp.broadcast_to(causal2, (N2, 1, seq2, seq2))

    out2, _ = self_attention_forward(values2, keys2, query2, mask2, params,
                                     embed_size, heads, block_q=128,
                                     block_k=128, return_attn=False)
    out2 = jax.block_until_ready(out2)
    out2_ref, _ = reference_forward(values2, keys2, query2, mask2, params,
                                    embed_size, heads)
    assert out2.shape == (N2, seq2, embed_size)
    assert jnp.allclose(out2, out2_ref, atol=5e-2, rtol=5e-2)

    print("KERNEL_OK")
</pallas_src>

<mosaic_0001>
module attributes {stable_mosaic.version = 11 : i64} {
  func.func @_fused_attn_kernel(%arg0: i32, %arg1: i32, %arg2: i32, %arg3: memref<1x8x32xbf16, #tpu.memory_space<vmem>>, %arg4: memref<1x8x32xbf16, #tpu.memory_space<vmem>>, %arg5: memref<1x8x32xbf16, #tpu.memory_space<vmem>>, %arg6: memref<1x8x8xi8, #tpu.memory_space<vmem>>, %arg7: memref<4x8x32xbf16, #tpu.memory_space<vmem>>, %arg8: memref<1x32xf32, #tpu.memory_space<vmem>>, %arg9: memref<1x8x32xf32, #tpu.memory_space<vmem>>, %arg10: memref<1x4x8x8xbf16, #tpu.memory_space<vmem>>, %arg11: memref<4x8x1xf32, #tpu.memory_space<vmem>>, %arg12: memref<4x8x1xf32, #tpu.memory_space<vmem>>, %arg13: memref<4x8x8xf32, #tpu.memory_space<vmem>>) attributes {dimension_semantics = [#tpu.dimension_semantics<parallel>, #tpu.dimension_semantics<arbitrary>, #tpu.dimension_semantics<arbitrary>], iteration_bounds = array<i64: 2, 1, 1>, scalar_prefetch = 0 : i64, scratch_operands = 3 : i64, tpu.core_type = #tpu.core_type<tc>, window_params = [{transform_indices = @transform_0, window_bounds = array<i64: 1, 8, 32>}, {pipeline_mode = #tpu.pipeline_mode<synchronous>, transform_indices = @transform_1, window_bounds = array<i64: 1, 8, 32>}, {pipeline_mode = #tpu.pipeline_mode<synchronous>, transform_indices = @transform_2, window_bounds = array<i64: 1, 8, 32>}, {transform_indices = @transform_3, window_bounds = array<i64: 1, 8, 8>}, {pipeline_mode = #tpu.pipeline_mode<synchronous>, transform_indices = @transform_4, window_bounds = array<i64: 4, 8, 32>}, {pipeline_mode = #tpu.pipeline_mode<synchronous>, transform_indices = @transform_5, window_bounds = array<i64: 1, 32>}, {transform_indices = @transform_6, window_bounds = array<i64: 1, 8, 32>}, {transform_indices = @transform_7, window_bounds = array<i64: 1, 4, 8, 8>}]} {
    %c0_i32 = arith.constant 0 : i32
    %0 = arith.cmpi eq, %arg2, %c0_i32 : i32
    %1 = arith.extui %0 : i1 to i32
    %c0_i32_0 = arith.constant 0 : i32
    %2 = arith.cmpi ne, %1, %c0_i32_0 : i32
    scf.if %2 {
      %cst_119 = arith.constant 0xFF800000 : f32
      %197 = vector.broadcast %cst_119 : f32 to vector<4x8x1xf32>
      %c0_120 = arith.constant 0 : index
      %c0_121 = arith.constant 0 : index
      %c0_122 = arith.constant 0 : index
      %198 = vector.load %arg11[%c0_120, %c0_121, %c0_122] : memref<4x8x1xf32, #tpu.memory_space<vmem>>, vector<4x8x1xf32>
      tpu.vector_store %arg11[%c0_120, %c0_121, %c0_122], %197 {strides = array<i32>} : memref<4x8x1xf32, #tpu.memory_space<vmem>>, vector<4x8x1xf32>,
      %cst_123 = arith.constant 0.000000e+00 : f32
      %199 = vector.broadcast %cst_123 : f32 to vector<4x8x1xf32>
      %c0_124 = arith.constant 0 : index
      %c0_125 = arith.constant 0 : index
      %c0_126 = arith.constant 0 : index
      %200 = vector.load %arg12[%c0_124, %c0_125, %c0_126] : memref<4x8x1xf32, #tpu.memory_space<vmem>>, vector<4x8x1xf32>
      tpu.vector_store %arg12[%c0_124, %c0_125, %c0_126], %199 {strides = array<i32>} : memref<4x8x1xf32, #tpu.memory_space<vmem>>, vector<4x8x1xf32>,
      %cst_127 = arith.constant 0.000000e+00 : f32
      %201 = vector.broadcast %cst_127 : f32 to vector<4x8x8xf32>
      %c0_128 = arith.constant 0 : index
      %c0_129 = arith.constant 0 : index
      %c0_130 = arith.constant 0 : index
      %202 = vector.load %arg13[%c0_128, %c0_129, %c0_130] : memref<4x8x8xf32, #tpu.memory_space<vmem>>, vector<4x8x8xf32>
      tpu.vector_store %arg13[%c0_128, %c0_129, %c0_130], %201 {strides = array<i32>} : memref<4x8x8xf32, #tpu.memory_space<vmem>>, vector<4x8x8xf32>,
    } else {
    }
    %c0 = arith.constant 0 : index
    %c0_1 = arith.constant 0 : index
    %c0_2 = arith.constant 0 : index
    %3 = vector.load %arg3[%c0, %c0_1, %c0_2] : memref<1x8x32xbf16, #tpu.memory_space<vmem>>, vector<1x8x32xbf16>
    %4 = vector.shape_cast %3 : vector<1x8x32xbf16> to vector<8x32xbf16>
    %c0_3 = arith.constant 0 : index
    %c0_4 = arith.constant 0 : index
    %c0_5 = arith.constant 0 : index
    %5 = vector.load %arg4[%c0_3, %c0_4, %c0_5] : memref<1x8x32xbf16, #tpu.memory_space<vmem>>, vector<1x8x32xbf16>
    %6 = vector.shape_cast %5 : vector<1x8x32xbf16> to vector<8x32xbf16>
    %c0_6 = arith.constant 0 : index
    %c0_7 = arith.constant 0 : index
    %c0_8 = arith.constant 0 : index
    %7 = vector.load %arg5[%c0_6, %c0_7, %c0_8] : memref<1x8x32xbf16, #tpu.memory_space<vmem>>, vector<1x8x32xbf16>
    %8 = vector.shape_cast %7 : vector<1x8x32xbf16> to vector<8x32xbf16>
    %c0_9 = arith.constant 0 : index
    %c0_10 = arith.constant 0 : index
    %c0_11 = arith.constant 0 : index
    %9 = vector.load %arg6[%c0_9, %c0_10, %c0_11] : memref<1x8x8xi8, #tpu.memory_space<vmem>>, vector<1x8x8xi8>
    %10 = vector.shape_cast %9 : vector<1x8x8xi8> to vector<8x8xi8>
    %11 = arith.extsi %10 : vector<8x8xi8> to vector<8x8xi32>
    %c0_i32_12 = arith.constant 0 : i32
    %12 = vector.broadcast %c0_i32_12 : i32 to vector<8x8xi32>
    %13 = arith.cmpi eq, %11, %12 : vector<8x8xi32>
    %14 = vector.extract_strided_slice %4 {offsets = [0, 0], sizes = [8, 8], strides = [1, 1]} : vector<8x32xbf16> to vector<8x8xbf16>
    %15 = vector.extract_strided_slice %6 {offsets = [0, 0], sizes = [8, 8], strides = [1, 1]} : vector<8x32xbf16> to vector<8x8xbf16>
    %cst = arith.constant dense<0.000000e+00> : vector<8x8xf32>
    %16 = tpu.matmul %14, %15, %cst {dimension_numbers = #tpu.dot_dimension_numbers<[1], [1], [0], [0], [0, 0, 1, 0], [], []>} : vector<8x8xbf16>, vector<8x8xbf16>, vector<8x8xf32> -> vector<8x8xf32>
    %cst_13 = arith.constant -1.000000e+20 : f32
    %17 = vector.broadcast %cst_13 : f32 to vector<8x8xf32>
    %18 = arith.select %13, %17, %16 : vector<8x8xi1>, vector<8x8xf32>
    %c0_14 = arith.constant 0 : index
    %c0_15 = arith.constant 0 : index
    %c0_16 = arith.constant 0 : index
    %19 = vector.load %arg11[%c0_14, %c0_15, %c0_16] : memref<4x8x1xf32, #tpu.memory_space<vmem>>, vector<1x8x1xf32>
    %20 = vector.shape_cast %19 : vector<1x8x1xf32> to vector<8x1xf32>
    %cst_17 = arith.constant dense<0xFF800000> : vector<8xf32>
    %21 = vector.multi_reduction <maximumf>, %18, %cst_17 [1] : vector<8x8xf32> to vector<8xf32>
    %22 = vector.shape_cast %21 : vector<8xf32> to vector<8x1xf32>
    %23 = arith.maximumf %20, %22 : vector<8x1xf32>
    %24 = arith.subf %20, %23 : vector<8x1xf32>
    %25 = math.exp %24 : vector<8x1xf32>
    %26 = vector.broadcast %23 : vector<8x1xf32> to vector<8x8xf32>
    %27 = arith.subf %18, %26 : vector<8x8xf32>
    %28 = math.exp %27 : vector<8x8xf32>
    %c0_18 = arith.constant 0 : index
    %c0_19 = arith.constant 0 : index
    %c0_20 = arith.constant 0 : index
    %29 = vector.load %arg12[%c0_18, %c0_19, %c0_20] : memref<4x8x1xf32, #tpu.memory_space<vmem>>, vector<1x8x1xf32>
    %30 = vector.shape_cast %29 : vector<1x8x1xf32> to vector<8x1xf32>
    %31 = arith.mulf %25, %30 : vector<8x1xf32>
    %cst_21 = arith.constant dense<0.000000e+00> : vector<8xf32>
    %32 = vector.multi_reduction <add>, %28, %cst_21 [1] : vector<8x8xf32> to vector<8xf32>
    %33 = vector.shape_cast %32 : vector<8xf32> to vector<8x1xf32>
    %34 = arith.addf %31, %33 : vector<8x1xf32>
    %c0_22 = arith.constant 0 : index
    %c0_23 = arith.constant 0 : index
    %c0_24 = arith.constant 0 : index
    %35 = vector.load %arg12[%c0_22, %c0_23, %c0_24] : memref<4x8x1xf32, #tpu.memory_space<vmem>>, vector<1x8x1xf32>
    %36 = vector.shape_cast %35 : vector<1x8x1xf32> to vector<8x1xf32>
    %37 = vector.shape_cast %34 : vector<8x1xf32> to vector<1x8x1xf32>
    tpu.vector_store %arg12[%c0_22, %c0_23, %c0_24], %37 {strides = array<i32>} : memref<4x8x1xf32, #tpu.memory_space<vmem>>, vector<1x8x1xf32>,
    %c0_25 = arith.constant 0 : index
    %c0_26 = arith.constant 0 : index
    %c0_27 = arith.constant 0 : index
    %38 = vector.load %arg13[%c0_25, %c0_26, %c0_27] : memref<4x8x8xf32, #tpu.memory_space<vmem>>, vector<1x8x8xf32>
    %39 = vector.shape_cast %38 : vector<1x8x8xf32> to vector<8x8xf32>
    %40 = vector.broadcast %25 : vector<8x1xf32> to vector<8x8xf32>
    %41 = arith.mulf %40, %39 : vector<8x8xf32>
    %42 = arith.truncf %28 : vector<8x8xf32> to vector<8x8xbf16>
    %43 = vector.extract_strided_slice %8 {offsets = [0, 0], sizes = [8, 8], strides = [1, 1]} : vector<8x32xbf16> to vector<8x8xbf16>
    %cst_28 = arith.constant dense<0.000000e+00> : vector<8x8xf32>
    %44 = tpu.matmul %42, %43, %cst_28 {dimension_numbers = #tpu.dot_dimension_numbers<[1], [0], [0], [1], [0, 0, 1, 1], [], []>} : vector<8x8xbf16>, vector<8x8xbf16>, vector<8x8xf32> -> vector<8x8xf32>
    %45 = arith.addf %41, %44 : vector<8x8xf32>
    %c0_29 = arith.constant 0 : index
    %c0_30 = arith.constant 0 : index
    %c0_31 = arith.constant 0 : index
    %46 = vector.load %arg13[%c0_29, %c0_30, %c0_31] : memref<4x8x8xf32, #tpu.memory_space<vmem>>, vector<1x8x8xf32>
    %47 = vector.shape_cast %46 : vector<1x8x8xf32> to vector<8x8xf32>
    %48 = vector.shape_cast %45 : vector<8x8xf32> to vector<1x8x8xf32>
    tpu.vector_store %arg13[%c0_29, %c0_30, %c0_31], %48 {strides = array<i32>} : memref<4x8x8xf32, #tpu.memory_space<vmem>>, vector<1x8x8xf32>,
    %c0_32 = arith.constant 0 : index
    %c0_33 = arith.constant 0 : index
    %c0_34 = arith.constant 0 : index
    %49 = vector.load %arg11[%c0_32, %c0_33, %c0_34] : memref<4x8x1xf32, #tpu.memory_space<vmem>>, vector<1x8x1xf32>
    %50 = vector.shape_cast %49 : vector<1x8x1xf32> to vector<8x1xf32>
    %51 = vector.shape_cast %23 : vector<8x1xf32> to vector<1x8x1xf32>
    tpu.vector_store %arg11[%c0_32, %c0_33, %c0_34], %51 {strides = array<i32>} : memref<4x8x1xf32, #tpu.memory_space<vmem>>, vector<1x8x1xf32>,
    %52 = tpu.reciprocal %34 {approx = true} : vector<8x1xf32> -> vector<8x1xf32>
    %53 = vector.broadcast %52 : vector<8x1xf32> to vector<8x8xf32>
    %54 = arith.mulf %28, %53 : vector<8x8xf32>
    %55 = arith.truncf %54 : vector<8x8xf32> to vector<8x8xbf16>
    %c0_35 = arith.constant 0 : index
    %c0_36 = arith.constant 0 : index
    %c0_37 = arith.constant 0 : index
    %c0_38 = arith.constant 0 : index
    %56 = vector.load %arg10[%c0_35, %c0_36, %c0_37, %c0_38] : memref<1x4x8x8xbf16, #tpu.memory_space<vmem>>, vector<1x1x8x8xbf16>
    %57 = vector.shape_cast %56 : vector<1x1x8x8xbf16> to vector<8x8xbf16>
    %58 = vector.shape_cast %55 : vector<8x8xbf16> to vector<1x1x8x8xbf16>
    tpu.vector_store %arg10[%c0_35, %c0_36, %c0_37, %c0_38], %58 {strides = array<i32>} : memref<1x4x8x8xbf16, #tpu.memory_space<vmem>>, vector<1x1x8x8xbf16>,
    %59 = vector.extract_strided_slice %4 {offsets = [0, 8], sizes = [8, 8], strides = [1, 1]} : vector<8x32xbf16> to vector<8x8xbf16>
    %60 = vector.extract_strided_slice %6 {offsets = [0, 8], sizes = [8, 8], strides = [1, 1]} : vector<8x32xbf16> to vector<8x8xbf16>
    %cst_39 = arith.constant dense<0.000000e+00> : vector<8x8xf32>
    %61 = tpu.matmul %59, %60, %cst_39 {dimension_numbers = #tpu.dot_dimension_numbers<[1], [1], [0], [0], [0, 0, 1, 0], [], []>} : vector<8x8xbf16>, vector<8x8xbf16>, vector<8x8xf32> -> vector<8x8xf32>
    %cst_40 = arith.constant -1.000000e+20 : f32
    %62 = vector.broadcast %cst_40 : f32 to vector<8x8xf32>
    %63 = arith.select %13, %62, %61 : vector<8x8xi1>, vector<8x8xf32>
    %c1 = arith.constant 1 : index
    %c0_41 = arith.constant 0 : index
    %c0_42 = arith.constant 0 : index
    %64 = vector.load %arg11[%c1, %c0_41, %c0_42] : memref<4x8x1xf32, #tpu.memory_space<vmem>>, vector<1x8x1xf32>
    %65 = vector.shape_cast %64 : vector<1x8x1xf32> to vector<8x1xf32>
    %cst_43 = arith.constant dense<0xFF800000> : vector<8xf32>
    %66 = vector.multi_reduction <maximumf>, %63, %cst_43 [1] : vector<8x8xf32> to vector<8xf32>
    %67 = vector.shape_cast %66 : vector<8xf32> to vector<8x1xf32>
    %68 = arith.maximumf %65, %67 : vector<8x1xf32>
    %69 = arith.subf %65, %68 : vector<8x1xf32>
    %70 = math.exp %69 : vector<8x1xf32>
    %71 = vector.broadcast %68 : vector<8x1xf32> to vector<8x8xf32>
    %72 = arith.subf %63, %71 : vector<8x8xf32>
    %73 = math.exp %72 : vector<8x8xf32>
    %c1_44 = arith.constant 1 : index
    %c0_45 = arith.constant 0 : index
    %c0_46 = arith.constant 0 : index
    %74 = vector.load %arg12[%c1_44, %c0_45, %c0_46] : memref<4x8x1xf32, #tpu.memory_space<vmem>>, vector<1x8x1xf32>
    %75 = vector.shape_cast %74 : vector<1x8x1xf32> to vector<8x1xf32>
    %76 = arith.mulf %70, %75 : vector<8x1xf32>
    %cst_47 = arith.constant dense<0.000000e+00> : vector<8xf32>
    %77 = vector.multi_reduction <add>, %73, %cst_47 [1] : vector<8x8xf32> to vector<8xf32>
    %78 = vector.shape_cast %77 : vector<8xf32> to vector<8x1xf32>
    %79 = arith.addf %76, %78 : vector<8x1xf32>
    %c1_48 = arith.constant 1 : index
    %c0_49 = arith.constant 0 : index
    %c0_50 = arith.constant 0 : index
    %80 = vector.load %arg12[%c1_48, %c0_49, %c0_50] : memref<4x8x1xf32, #tpu.memory_space<vmem>>, vector<1x8x1xf32>
    %81 = vector.shape_cast %80 : vector<1x8x1xf32> to vector<8x1xf32>
    %82 = vector.shape_cast %79 : vector<8x1xf32> to vector<1x8x1xf32>
    tpu.vector_store %arg12[%c1_48, %c0_49, %c0_50], %82 {strides = array<i32>} : memref<4x8x1xf32, #tpu.memory_space<vmem>>, vector<1x8x1xf32>,
    %c1_51 = arith.constant 1 : index
    %c0_52 = arith.constant 0 : index
    %c0_53 = arith.constant 0 : index
    %83 = vector.load %arg13[%c1_51, %c0_52, %c0_53] : memref<4x8x8xf32, #tpu.memory_space<vmem>>, vector<1x8x8xf32>
    %84 = vector.shape_cast %83 : vector<1x8x8xf32> to vector<8x8xf32>
    %85 = vector.broadcast %70 : vector<8x1xf32> to vector<8x8xf32>
    %86 = arith.mulf %85, %84 : vector<8x8xf32>
    %87 = arith.truncf %73 : vector<8x8xf32> to vector<8x8xbf16>
    %88 = vector.extract_strided_slice %8 {offsets = [0, 8], sizes = [8, 8], strides = [1, 1]} : vector<8x32xbf16> to vector<8x8xbf16>
    %cst_54 = arith.constant dense<0.000000e+00> : vector<8x8xf32>
    %89 = tpu.matmul %87, %88, %cst_54 {dimension_numbers = #tpu.dot_dimension_numbers<[1], [0], [0], [1], [0, 0, 1, 1], [], []>} : vector<8x8xbf16>, vector<8x8xbf16>, vector<8x8xf32> -> vector<8x8xf32>
    %90 = arith.addf %86, %89 : vector<8x8xf32>
    %c1_55 = arith.constant 1 : index
    %c0_56 = arith.constant 0 : index
    %c0_57 = arith.constant 0 : index
    %91 = vector.load %arg13[%c1_55, %c0_56, %c0_57] : memref<4x8x8xf32, #tpu.memory_space<vmem>>, vector<1x8x8xf32>
    %92 = vector.shape_cast %91 : vector<1x8x8xf32> to vector<8x8xf32>
    %93 = vector.shape_cast %90 : vector<8x8xf32> to vector<1x8x8xf32>
    tpu.vector_store %arg13[%c1_55, %c0_56, %c0_57], %93 {strides = array<i32>} : memref<4x8x8xf32, #tpu.memory_space<vmem>>, vector<1x8x8xf32>,
    %c1_58 = arith.constant 1 : index
    %c0_59 = arith.constant 0 : index
    %c0_60 = arith.constant 0 : index
    %94 = vector.load %arg11[%c1_58, %c0_59, %c0_60] : memref<4x8x1xf32, #tpu.memory_space<vmem>>, vector<1x8x1xf32>
    %95 = vector.shape_cast %94 : vector<1x8x1xf32> to vector<8x1xf32>
    %96 = vector.shape_cast %68 : vector<8x1xf32> to vector<1x8x1xf32>
    tpu.vector_store %arg11[%c1_58, %c0_59, %c0_60], %96 {strides = array<i32>} : memref<4x8x1xf32, #tpu.memory_space<vmem>>, vector<1x8x1xf32>,
    %97 = tpu.reciprocal %79 {approx = true} : vector<8x1xf32> -> vector<8x1xf32>
    %98 = vector.broadcast %97 : vector<8x1xf32> to vector<8x8xf32>
    %99 = arith.mulf %73, %98 : vector<8x8xf32>
    %100 = arith.truncf %99 : vector<8x8xf32> to vector<8x8xbf16>
    %c0_61 = arith.constant 0 : index
    %c1_62 = arith.constant 1 : index
    %c0_63 = arith.constant 0 : index
    %c0_64 = arith.constant 0 : index
    %101 = vector.load %arg10[%c0_61, %c1_62, %c0_63, %c0_64] : memref<1x4x8x8xbf16, #tpu.memory_space<vmem>>, vector<1x1x8x8xbf16>
    %102 = vector.shape_cast %101 : vector<1x1x8x8xbf16> to vector<8x8xbf16>
    %103 = vector.shape_cast %100 : vector<8x8xbf16> to vector<1x1x8x8xbf16>
    tpu.vector_store %arg10[%c0_61, %c1_62, %c0_63, %c0_64], %103 {strides = array<i32>} : memref<1x4x8x8xbf16, #tpu.memory_space<vmem>>, vector<1x1x8x8xbf16>,
    %104 = vector.extract_strided_slice %4 {offsets = [0, 16], sizes = [8, 8], strides = [1, 1]} : vector<8x32xbf16> to vector<8x8xbf16>
    %105 = vector.extract_strided_slice %6 {offsets = [0, 16], sizes = [8, 8], strides = [1, 1]} : vector<8x32xbf16> to vector<8x8xbf16>
    %cst_65 = arith.constant dense<0.000000e+00> : vector<8x8xf32>
    %106 = tpu.matmul %104, %105, %cst_65 {dimension_numbers = #tpu.dot_dimension_numbers<[1], [1], [0], [0], [0, 0, 1, 0], [], []>} : vector<8x8xbf16>, vector<8x8xbf16>, vector<8x8xf32> -> vector<8x8xf32>
    %cst_66 = arith.constant -1.000000e+20 : f32
    %107 = vector.broadcast %cst_66 : f32 to vector<8x8xf32>
    %108 = arith.select %13, %107, %106 : vector<8x8xi1>, vector<8x8xf32>
    %c2 = arith.constant 2 : index
    %c0_67 = arith.constant 0 : index
    %c0_68 = arith.constant 0 : index
    %109 = vector.load %arg11[%c2, %c0_67, %c0_68] : memref<4x8x1xf32, #tpu.memory_space<vmem>>, vector<1x8x1xf32>
    %110 = vector.shape_cast %109 : vector<1x8x1xf32> to vector<8x1xf32>
    %cst_69 = arith.constant dense<0xFF800000> : vector<8xf32>
    %111 = vector.multi_reduction <maximumf>, %108, %cst_69 [1] : vector<8x8xf32> to vector<8xf32>
    %112 = vector.shape_cast %111 : vector<8xf32> to vector<8x1xf32>
    %113 = arith.maximumf %110, %112 : vector<8x1xf32>
    %114 = arith.subf %110, %113 : vector<8x1xf32>
    %115 = math.exp %114 : vector<8x1xf32>
    %116 = vector.broadcast %113 : vector<8x1xf32> to vector<8x8xf32>
    %117 = arith.subf %108, %116 : vector<8x8xf32>
    %118 = math.exp %117 : vector<8x8xf32>
    %c2_70 = arith.constant 2 : index
    %c0_71 = arith.constant 0 : index
    %c0_72 = arith.constant 0 : index
    %119 = vector.load %arg12[%c2_70, %c0_71, %c0_72] : memref<4x8x1xf32, #tpu.memory_space<vmem>>, vector<1x8x1xf32>
    %120 = vector.shape_cast %119 : vector<1x8x1xf32> to vector<8x1xf32>
    %121 = arith.mulf %115, %120 : vector<8x1xf32>
    %cst_73 = arith.constant dense<0.000000e+00> : vector<8xf32>
    %122 = vector.multi_reduction <add>, %118, %cst_73 [1] : vector<8x8xf32> to vector<8xf32>
    %123 = vector.shape_cast %122 : vector<8xf32> to vector<8x1xf32>
    %124 = arith.addf %121, %123 : vector<8x1xf32>
    %c2_74 = arith.constant 2 : index
    %c0_75 = arith.constant 0 : index
    %c0_76 = arith.constant 0 : index
    %125 = vector.load %arg12[%c2_74, %c0_75, %c0_76] : memref<4x8x1xf32, #tpu.memory_space<vmem>>, vector<1x8x1xf32>
    %126 = vector.shape_cast %125 : vector<1x8x1xf32> to vector<8x1xf32>
    %127 = vector.shape_cast %124 : vector<8x1xf32> to vector<1x8x1xf32>
    tpu.vector_store %arg12[%c2_74, %c0_75, %c0_76], %127 {strides = array<i32>} : memref<4x8x1xf32, #tpu.memory_space<vmem>>, vector<1x8x1xf32>,
    %c2_77 = arith.constant 2 : index
    %c0_78 = arith.constant 0 : index
    %c0_79 = arith.constant 0 : index
    %128 = vector.load %arg13[%c2_77, %c0_78, %c0_79] : memref<4x8x8xf32, #tpu.memory_space<vmem>>, vector<1x8x8xf32>
    %129 = vector.shape_cast %128 : vector<1x8x8xf32> to vector<8x8xf32>
    %130 = vector.broadcast %115 : vector<8x1xf32> to vector<8x8xf32>
    %131 = arith.mulf %130, %129 : vector<8x8xf32>
    %132 = arith.truncf %118 : vector<8x8xf32> to vector<8x8xbf16>
    %133 = vector.extract_strided_slice %8 {offsets = [0, 16], sizes = [8, 8], strides = [1, 1]} : vector<8x32xbf16> to vector<8x8xbf16>
    %cst_80 = arith.constant dense<0.000000e+00> : vector<8x8xf32>
    %134 = tpu.matmul %132, %133, %cst_80 {dimension_numbers = #tpu.dot_dimension_numbers<[1], [0], [0], [1], [0, 0, 1, 1], [], []>} : vector<8x8xbf16>, vector<8x8xbf16>, vector<8x8xf32> -> vector<8x8xf32>
    %135 = arith.addf %131, %134 : vector<8x8xf32>
    %c2_81 = arith.constant 2 : index
    %c0_82 = arith.constant 0 : index
    %c0_83 = arith.constant 0 : index
    %136 = vector.load %arg13[%c2_81, %c0_82, %c0_83] : memref<4x8x8xf32, #tpu.memory_space<vmem>>, vector<1x8x8xf32>
    %137 = vector.shape_cast %136 : vector<1x8x8xf32> to vector<8x8xf32>
    %138 = vector.shape_cast %135 : vector<8x8xf32> to vector<1x8x8xf32>
    tpu.vector_store %arg13[%c2_81, %c0_82, %c0_83], %138 {strides = array<i32>} : memref<4x8x8xf32, #tpu.memory_space<vmem>>, vector<1x8x8xf32>,
    %c2_84 = arith.constant 2 : index
    %c0_85 = arith.constant 0 : index
    %c0_86 = arith.constant 0 : index
    %139 = vector.load %arg11[%c2_84, %c0_85, %c0_86] : memref<4x8x1xf32, #tpu.memory_space<vmem>>, vector<1x8x1xf32>
    %140 = vector.shape_cast %139 : vector<1x8x1xf32> to vector<8x1xf32>
    %141 = vector.shape_cast %113 : vector<8x1xf32> to vector<1x8x1xf32>
    tpu.vector_store %arg11[%c2_84, %c0_85, %c0_86], %141 {strides = array<i32>} : memref<4x8x1xf32, #tpu.memory_space<vmem>>, vector<1x8x1xf32>,
    %142 = tpu.reciprocal %124 {approx = true} : vector<8x1xf32> -> vector<8x1xf32>
    %143 = vector.broadcast %142 : vector<8x1xf32> to vector<8x8xf32>
    %144 = arith.mulf %118, %143 : vector<8x8xf32>
    %145 = arith.truncf %144 : vector<8x8xf32> to vector<8x8xbf16>
    %c0_87 = arith.constant 0 : index
    %c2_88 = arith.constant 2 : index
    %c0_89 = arith.constant 0 : index
    %c0_90 = arith.constant 0 : index
    %146 = vector.load %arg10[%c0_87, %c2_88, %c0_89, %c0_90] : memref<1x4x8x8xbf16, #tpu.memory_space<vmem>>, vector<1x1x8x8xbf16>
    %147 = vector.shape_cast %146 : vector<1x1x8x8xbf16> to vector<8x8xbf16>
    %148 = vector.shape_cast %145 : vector<8x8xbf16> to vector<1x1x8x8xbf16>
    tpu.vector_store %arg10[%c0_87, %c2_88, %c0_89, %c0_90], %148 {strides = array<i32>} : memref<1x4x8x8xbf16, #tpu.memory_space<vmem>>, vector<1x1x8x8xbf16>,
    %149 = vector.extract_strided_slice %4 {offsets = [0, 24], sizes = [8, 8], strides = [1, 1]} : vector<8x32xbf16> to vector<8x8xbf16>
    %150 = vector.extract_strided_slice %6 {offsets = [0, 24], sizes = [8, 8], strides = [1, 1]} : vector<8x32xbf16> to vector<8x8xbf16>
    %cst_91 = arith.constant dense<0.000000e+00> : vector<8x8xf32>
    %151 = tpu.matmul %149, %150, %cst_91 {dimension_numbers = #tpu.dot_dimension_numbers<[1], [1], [0], [0], [0, 0, 1, 0], [], []>} : vector<8x8xbf16>, vector<8x8xbf16>, vector<8x8xf32> -> vector<8x8xf32>
    %cst_92 = arith.constant -1.000000e+20 : f32
    %152 = vector.broadcast %cst_92 : f32 to vector<8x8xf32>
    %153 = arith.select %13, %152, %151 : vector<8x8xi1>, vector<8x8xf32>
    %c3 = arith.constant 3 : index
    %c0_93 = arith.constant 0 : index
    %c0_94 = arith.constant 0 : index
    %154 = vector.load %arg11[%c3, %c0_93, %c0_94] : memref<4x8x1xf32, #tpu.memory_space<vmem>>, vector<1x8x1xf32>
    %155 = vector.shape_cast %154 : vector<1x8x1xf32> to vector<8x1xf32>
    %cst_95 = arith.constant dense<0xFF800000> : vector<8xf32>
    %156 = vector.multi_reduction <maximumf>, %153, %cst_95 [1] : vector<8x8xf32> to vector<8xf32>
    %157 = vector.shape_cast %156 : vector<8xf32> to vector<8x1xf32>
    %158 = arith.maximumf %155, %157 : vector<8x1xf32>
    %159 = arith.subf %155, %158 : vector<8x1xf32>
    %160 = math.exp %159 : vector<8x1xf32>
    %161 = vector.broadcast %158 : vector<8x1xf32> to vector<8x8xf32>
    %162 = arith.subf %153, %161 : vector<8x8xf32>
    %163 = math.exp %162 : vector<8x8xf32>
    %c3_96 = arith.constant 3 : index
    %c0_97 = arith.constant 0 : index
    %c0_98 = arith.constant 0 : index
    %164 = vector.load %arg12[%c3_96, %c0_97, %c0_98] : memref<4x8x1xf32, #tpu.memory_space<vmem>>, vector<1x8x1xf32>
    %165 = vector.shape_cast %164 : vector<1x8x1xf32> to vector<8x1xf32>
    %166 = arith.mulf %160, %165 : vector<8x1xf32>
    %cst_99 = arith.constant dense<0.000000e+00> : vector<8xf32>
    %167 = vector.multi_reduction <add>, %163, %cst_99 [1] : vector<8x8xf32> to vector<8xf32>
    %168 = vector.shape_cast %167 : vector<8xf32> to vector<8x1xf32>
    %169 = arith.addf %166, %168 : vector<8x1xf32>
    %c3_100 = arith.constant 3 : index
    %c0_101 = arith.constant 0 : index
    %c0_102 = arith.constant 0 : index
    %170 = vector.load %arg12[%c3_100, %c0_101, %c0_102] : memref<4x8x1xf32, #tpu.memory_space<vmem>>, vector<1x8x1xf32>
    %171 = vector.shape_cast %170 : vector<1x8x1xf32> to vector<8x1xf32>
    %172 = vector.shape_cast %169 : vector<8x1xf32> to vector<1x8x1xf32>
    tpu.vector_store %arg12[%c3_100, %c0_101, %c0_102], %172 {strides = array<i32>} : memref<4x8x1xf32, #tpu.memory_space<vmem>>, vector<1x8x1xf32>,
    %c3_103 = arith.constant 3 : index
    %c0_104 = arith.constant 0 : index
    %c0_105 = arith.constant 0 : index
    %173 = vector.load %arg13[%c3_103, %c0_104, %c0_105] : memref<4x8x8xf32, #tpu.memory_space<vmem>>, vector<1x8x8xf32>
    %174 = vector.shape_cast %173 : vector<1x8x8xf32> to vector<8x8xf32>
    %175 = vector.broadcast %160 : vector<8x1xf32> to vector<8x8xf32>
    %176 = arith.mulf %175, %174 : vector<8x8xf32>
    %177 = arith.truncf %163 : vector<8x8xf32> to vector<8x8xbf16>
    %178 = vector.extract_strided_slice %8 {offsets = [0, 24], sizes = [8, 8], strides = [1, 1]} : vector<8x32xbf16> to vector<8x8xbf16>
    %cst_106 = arith.constant dense<0.000000e+00> : vector<8x8xf32>
    %179 = tpu.matmul %177, %178, %cst_106 {dimension_numbers = #tpu.dot_dimension_numbers<[1], [0], [0], [1], [0, 0, 1, 1], [], []>} : vector<8x8xbf16>, vector<8x8xbf16>, vector<8x8xf32> -> vector<8x8xf32>
    %180 = arith.addf %176, %179 : vector<8x8xf32>
    %c3_107 = arith.constant 3 : index
    %c0_108 = arith.constant 0 : index
    %c0_109 = arith.constant 0 : index
    %181 = vector.load %arg13[%c3_107, %c0_108, %c0_109] : memref<4x8x8xf32, #tpu.memory_space<vmem>>, vector<1x8x8xf32>
    %182 = vector.shape_cast %181 : vector<1x8x8xf32> to vector<8x8xf32>
    %183 = vector.shape_cast %180 : vector<8x8xf32> to vector<1x8x8xf32>
    tpu.vector_store %arg13[%c3_107, %c0_108, %c0_109], %183 {strides = array<i32>} : memref<4x8x8xf32, #tpu.memory_space<vmem>>, vector<1x8x8xf32>,
    %c3_110 = arith.constant 3 : index
    %c0_111 = arith.constant 0 : index
    %c0_112 = arith.constant 0 : index
    %184 = vector.load %arg11[%c3_110, %c0_111, %c0_112] : memref<4x8x1xf32, #tpu.memory_space<vmem>>, vector<1x8x1xf32>
    %185 = vector.shape_cast %184 : vector<1x8x1xf32> to vector<8x1xf32>
    %186 = vector.shape_cast %158 : vector<8x1xf32> to vector<1x8x1xf32>
    tpu.vector_store %arg11[%c3_110, %c0_111, %c0_112], %186 {strides = array<i32>} : memref<4x8x1xf32, #tpu.memory_space<vmem>>, vector<1x8x1xf32>,
    %187 = tpu.reciprocal %169 {approx = true} : vector<8x1xf32> -> vector<8x1xf32>
    %188 = vector.broadcast %187 : vector<8x1xf32> to vector<8x8xf32>
    %189 = arith.mulf %163, %188 : vector<8x8xf32>
    %190 = arith.truncf %189 : vector<8x8xf32> to vector<8x8xbf16>
    %c0_113 = arith.constant 0 : index
    %c3_114 = arith.constant 3 : index
    %c0_115 = arith.constant 0 : index
    %c0_116 = arith.constant 0 : index
    %191 = vector.load %arg10[%c0_113, %c3_114, %c0_115, %c0_116] : memref<1x4x8x8xbf16, #tpu.memory_space<vmem>>, vector<1x1x8x8xbf16>
    %192 = vector.shape_cast %191 : vector<1x1x8x8xbf16> to vector<8x8xbf16>
    %193 = vector.shape_cast %190 : vector<8x8xbf16> to vector<1x1x8x8xbf16>
    tpu.vector_store %arg10[%c0_113, %c3_114, %c0_115, %c0_116], %193 {strides = array<i32>} : memref<1x4x8x8xbf16, #tpu.memory_space<vmem>>, vector<1x1x8x8xbf16>,
    %c0_i32_117 = arith.constant 0 : i32
    %194 = arith.cmpi eq, %arg2, %c0_i32_117 : i32
    %195 = arith.extui %194 : i1 to i32
    %c0_i32_118 = arith.constant 0 : i32
    %196 = arith.cmpi ne, %195, %c0_i32_118 : i32
    scf.if %196 {
      %cst_119 = arith.constant 0.000000e+00 : f32
      %197 = vector.broadcast %cst_119 : f32 to vector<8x32xf32>
      %c0_120 = arith.constant 0 : index
      %c0_121 = arith.constant 0 : index
      %c0_122 = arith.constant 0 : index
      %198 = vector.load %arg13[%c0_120, %c0_121, %c0_122] : memref<4x8x8xf32, #tpu.memory_space<vmem>>, vector<1x8x8xf32>
      %199 = vector.shape_cast %198 : vector<1x8x8xf32> to vector<8x8xf32>
      %c0_123 = arith.constant 0 : index
      %c0_124 = arith.constant 0 : index
      %c0_125 = arith.constant 0 : index
      %200 = vector.load %arg12[%c0_123, %c0_124, %c0_125] : memref<4x8x1xf32, #tpu.memory_space<vmem>>, vector<1x8x1xf32>
      %201 = vector.shape_cast %200 : vector<1x8x1xf32> to vector<8x1xf32>
      %202 = tpu.reciprocal %201 {approx = true} : vector<8x1xf32> -> vector<8x1xf32>
      %203 = vector.broadcast %202 : vector<8x1xf32> to vector<8x8xf32>
      %204 = arith.mulf %199, %203 : vector<8x8xf32>
      %205 = arith.truncf %204 : vector<8x8xf32> to vector<8x8xbf16>
      %c0_126 = arith.constant 0 : index
      %c0_127 = arith.constant 0 : index
      %c0_128 = arith.constant 0 : index
      %206 = vector.load %arg7[%c0_126, %c0_127, %c0_128] : memref<4x8x32xbf16, #tpu.memory_space<vmem>>, vector<1x8x32xbf16>
      %207 = vector.shape_cast %206 : vector<1x8x32xbf16> to vector<8x32xbf16>
      %cst_129 = arith.constant dense<0.000000e+00> : vector<8x32xf32>
      %208 = tpu.matmul %205, %207, %cst_129 {dimension_numbers = #tpu.dot_dimension_numbers<[1], [0], [0], [1], [0, 0, 1, 1], [], []>} : vector<8x8xbf16>, vector<8x32xbf16>, vector<8x32xf32> -> vector<8x32xf32>
      %209 = arith.addf %197, %208 : vector<8x32xf32>
      %c1_130 = arith.constant 1 : index
      %c0_131 = arith.constant 0 : index
      %c0_132 = arith.constant 0 : index
      %210 = vector.load %arg13[%c1_130, %c0_131, %c0_132] : memref<4x8x8xf32, #tpu.memory_space<vmem>>, vector<1x8x8xf32>
      %211 = vector.shape_cast %210 : vector<1x8x8xf32> to vector<8x8xf32>
      %c1_133 = arith.constant 1 : index
      %c0_134 = arith.constant 0 : index
      %c0_135 = arith.constant 0 : index
      %212 = vector.load %arg12[%c1_133, %c0_134, %c0_135] : memref<4x8x1xf32, #tpu.memory_space<vmem>>, vector<1x8x1xf32>
      %213 = vector.shape_cast %212 : vector<1x8x1xf32> to vector<8x1xf32>
      %214 = tpu.reciprocal %213 {approx = true} : vector<8x1xf32> -> vector<8x1xf32>
      %215 = vector.broadcast %214 : vector<8x1xf32> to vector<8x8xf32>
      %216 = arith.mulf %211, %215 : vector<8x8xf32>
      %217 = arith.truncf %216 : vector<8x8xf32> to vector<8x8xbf16>
      %c1_136 = arith.constant 1 : index
      %c0_137 = arith.constant 0 : index
      %c0_138 = arith.constant 0 : index
      %218 = vector.load %arg7[%c1_136, %c0_137, %c0_138] : memref<4x8x32xbf16, #tpu.memory_space<vmem>>, vector<1x8x32xbf16>
      %219 = vector.shape_cast %218 : vector<1x8x32xbf16> to vector<8x32xbf16>
      %cst_139 = arith.constant dense<0.000000e+00> : vector<8x32xf32>
      %220 = tpu.matmul %217, %219, %cst_139 {dimension_numbers = #tpu.dot_dimension_numbers<[1], [0], [0], [1], [0, 0, 1, 1], [], []>} : vector<8x8xbf16>, vector<8x32xbf16>, vector<8x32xf32> -> vector<8x32xf32>
      %221 = arith.addf %209, %220 : vector<8x32xf32>
      %c2_140 = arith.constant 2 : index
      %c0_141 = arith.constant 0 : index
      %c0_142 = arith.constant 0 : index
      %222 = vector.load %arg13[%c2_140, %c0_141, %c0_142] : memref<4x8x8xf32, #tpu.memory_space<vmem>>, vector<1x8x8xf32>
      %223 = vector.shape_cast %222 : vector<1x8x8xf32> to vector<8x8xf32>
      %c2_143 = arith.constant 2 : index
      %c0_144 = arith.constant 0 : index
      %c0_145 = arith.constant 0 : index
      %224 = vector.load %arg12[%c2_143, %c0_144, %c0_145] : memref<4x8x1xf32, #tpu.memory_space<vmem>>, vector<1x8x1xf32>
      %225 = vector.shape_cast %224 : vector<1x8x1xf32> to vector<8x1xf32>
      %226 = tpu.reciprocal %225 {approx = true} : vector<8x1xf32> -> vector<8x1xf32>
      %227 = vector.broadcast %226 : vector<8x1xf32> to vector<8x8xf32>
      %228 = arith.mulf %223, %227 : vector<8x8xf32>
      %229 = arith.truncf %228 : vector<8x8xf32> to vector<8x8xbf16>
      %c2_146 = arith.constant 2 : index
      %c0_147 = arith.constant 0 : index
      %c0_148 = arith.constant 0 : index
      %230 = vector.load %arg7[%c2_146, %c0_147, %c0_148] : memref<4x8x32xbf16, #tpu.memory_space<vmem>>, vector<1x8x32xbf16>
      %231 = vector.shape_cast %230 : vector<1x8x32xbf16> to vector<8x32xbf16>
      %cst_149 = arith.constant dense<0.000000e+00> : vector<8x32xf32>
      %232 = tpu.matmul %229, %231, %cst_149 {dimension_numbers = #tpu.dot_dimension_numbers<[1], [0], [0], [1], [0, 0, 1, 1], [], []>} : vector<8x8xbf16>, vector<8x32xbf16>, vector<8x32xf32> -> vector<8x32xf32>
      %233 = arith.addf %221, %232 : vector<8x32xf32>
      %c3_150 = arith.constant 3 : index
      %c0_151 = arith.constant 0 : index
      %c0_152 = arith.constant 0 : index
      %234 = vector.load %arg13[%c3_150, %c0_151, %c0_152] : memref<4x8x8xf32, #tpu.memory_space<vmem>>, vector<1x8x8xf32>
      %235 = vector.shape_cast %234 : vector<1x8x8xf32> to vector<8x8xf32>
      %c3_153 = arith.constant 3 : index
      %c0_154 = arith.constant 0 : index
      %c0_155 = arith.constant 0 : index
      %236 = vector.load %arg12[%c3_153, %c0_154, %c0_155] : memref<4x8x1xf32, #tpu.memory_space<vmem>>, vector<1x8x1xf32>
      %237 = vector.shape_cast %236 : vector<1x8x1xf32> to vector<8x1xf32>
      %238 = tpu.reciprocal %237 {approx = true} : vector<8x1xf32> -> vector<8x1xf32>
      %239 = vector.broadcast %238 : vector<8x1xf32> to vector<8x8xf32>
      %240 = arith.mulf %235, %239 : vector<8x8xf32>
      %241 = arith.truncf %240 : vector<8x8xf32> to vector<8x8xbf16>
      %c3_156 = arith.constant 3 : index
      %c0_157 = arith.constant 0 : index
      %c0_158 = arith.constant 0 : index
      %242 = vector.load %arg7[%c3_156, %c0_157, %c0_158] : memref<4x8x32xbf16, #tpu.memory_space<vmem>>, vector<1x8x32xbf16>
      %243 = vector.shape_cast %242 : vector<1x8x32xbf16> to vector<8x32xbf16>
      %cst_159 = arith.constant dense<0.000000e+00> : vector<8x32xf32>
      %244 = tpu.matmul %241, %243, %cst_159 {dimension_numbers = #tpu.dot_dimension_numbers<[1], [0], [0], [1], [0, 0, 1, 1], [], []>} : vector<8x8xbf16>, vector<8x32xbf16>, vector<8x32xf32> -> vector<8x32xf32>
      %245 = arith.addf %233, %244 : vector<8x32xf32>
      %c0_160 = arith.constant 0 : index
      %c0_161 = arith.constant 0 : index
      %246 = vector.load %arg8[%c0_160, %c0_161] : memref<1x32xf32, #tpu.memory_space<vmem>>, vector<1x32xf32>
      %247 = vector.broadcast %246 : vector<1x32xf32> to vector<8x32xf32>
      %248 = arith.addf %245, %247 : vector<8x32xf32>
      %c0_162 = arith.constant 0 : index
      %c0_163 = arith.constant 0 : index
      %c0_164 = arith.constant 0 : index
      %249 = vector.load %arg9[%c0_162, %c0_163, %c0_164] : memref<1x8x32xf32, #tpu.memory_space<vmem>>, vector<1x8x32xf32>
      %250 = vector.shape_cast %249 : vector<1x8x32xf32> to vector<8x32xf32>
      %251 = vector.shape_cast %248 : vector<8x32xf32> to vector<1x8x32xf32>
      tpu.vector_store %arg9[%c0_162, %c0_163, %c0_164], %251 {strides = array<i32>} : memref<1x8x32xf32, #tpu.memory_space<vmem>>, vector<1x8x32xf32>,
    } else {
    }
    return
  }
  func.func @transform_0(%arg0: i32, %arg1: i32, %arg2: i32) -> (i32, i32, i32) {
    %c0_i32 = arith.constant 0 : i32
    %c0_i32_0 = arith.constant 0 : i32
    return %arg0, %arg1, %c0_i32 : i32, i32, i32
  }
  func.func @transform_1(%arg0: i32, %arg1: i32, %arg2: i32) -> (i32, i32, i32) {
    %c0_i32 = arith.constant 0 : i32
    %c0_i32_0 = arith.constant 0 : i32
    return %arg0, %arg2, %c0_i32 : i32, i32, i32
  }
  func.func @transform_2(%arg0: i32, %arg1: i32, %arg2: i32) -> (i32, i32, i32) {
    %c0_i32 = arith.constant 0 : i32
    %c0_i32_0 = arith.constant 0 : i32
    return %arg0, %arg2, %c0_i32 : i32, i32, i32
  }
  func.func @transform_3(%arg0: i32, %arg1: i32, %arg2: i32) -> (i32, i32, i32) {
    %c0_i32 = arith.constant 0 : i32
    return %arg0, %arg1, %arg2 : i32, i32, i32
  }
  func.func @transform_4(%arg0: i32, %arg1: i32, %arg2: i32) -> (i32, i32, i32) {
    %c0_i32 = arith.constant 0 : i32
    %c0_i32_0 = arith.constant 0 : i32
    %c0_i32_1 = arith.constant 0 : i32
    %c0_i32_2 = arith.constant 0 : i32
    return %c0_i32, %c0_i32_0, %c0_i32_1 : i32, i32, i32
  }
  func.func @transform_5(%arg0: i32, %arg1: i32, %arg2: i32) -> (i32, i32) {
    %c0_i32 = arith.constant 0 : i32
    %c0_i32_0 = arith.constant 0 : i32
    %c0_i32_1 = arith.constant 0 : i32
    return %c0_i32, %c0_i32_0 : i32, i32
  }
  func.func @transform_6(%arg0: i32, %arg1: i32, %arg2: i32) -> (i32, i32, i32) {
    %c0_i32 = arith.constant 0 : i32
    %c0_i32_0 = arith.constant 0 : i32
    return %arg0, %arg1, %c0_i32 : i32, i32, i32
  }
  func.func @transform_7(%arg0: i32, %arg1: i32, %arg2: i32) -> (i32, i32, i32, i32) {
    %c0_i32 = arith.constant 0 : i32
    %c0_i32_0 = arith.constant 0 : i32
    %c0_i32_1 = arith.constant 0 : i32
    return %arg0, %c0_i32, %arg1, %c0_i32_0 : i32, i32, i32, i32
  }
}

</mosaic_0001>

<bundles_post_ra>
// kernel: tpu_custom_call.1
= control target key start
LH: loop header
LB: loop body
LE: loop exit
PB: predicated region body
PF: predicated region fallthrough
CT: control target
= control target key end

     0   :  { %s2571_s0 = inlined_call_operand.hbm [shape: bf16[2,8,32], index: 0, kind: input, shape index: {}]   ;;  %s2572_s1 = inlined_call_operand.hbm [shape: bf16[2,8,32], index: 1, kind: input, shape index: {}]   ;;  %s2573_s2 = inlined_call_operand.hbm [shape: bf16[2,8,32], index: 2, kind: input, shape index: {}]   ;;  %s2574_s3 = inlined_call_operand.vmem [shape: s8[2,8,8], index: 3, kind: input, shape index: {}]   ;;  %s2575_s4 = inlined_call_operand.hbm [shape: bf16[4,8,32], index: 4, kind: input, shape index: {}]   ;;  %s2576_s5 = inlined_call_operand.vmem [shape: f32[1,32], index: 5, kind: input, shape index: {}]   ;;  %s2577_s6 = inlined_call_operand.hbm [shape: f32[2,8,32], index: 6, kind: output, shape index: {0}]   ;;  %s2578_s7 = inlined_call_operand.hbm [shape: bf16[2,4,8,8], index: 7, kind: output, shape index: {1}]  }
   0x1   :  { %2586 = sst [smem:[#allocation21_spill]] %s2572_s1 }
   0x2   :  { %13 = vsyncpa [#allocation6], 0 }
   0x3   :  { %15 = vsyncpa [#allocation6 + $0x1], 0 }
   0x4   :  { %16 = vsyncpa [#allocation9], 0 }
   0x5   :  { %17 = vsyncpa [#allocation12], 0 }
   0x6   :  { %18 = vsyncpa [#allocation7], 0 }
   0x7   :  { %20 = vsyncpa [#allocation7 + $0x1], 0 }
   0x8   :  { %21 = vsyncpa [#allocation15], 0 }
   0x9   :  { %23 = vsyncpa [#allocation15 + $0x1], 0  ;;  %s2069_s24 = smov 0   ;;  %s2071_s25 = smov 0  }
   0xa   :  { %s2073_s26 = smov 0   ;;  %s2075_s27 = smov 0  }
   0xb   :  { %s2077_s28 = smov 0   ;;  %s2079_s29 = smov 0  }
   0xc LB: > { %s1495_s30 = sadd.s32 4294967295, %s2010_s29   ;;  %s1496_s8 = sadd.s32 4294967294, %s2010_s29   ;;  %s2010_s29 = sphi %s2079_s29, %s29_s29   ;;  %s2006_s28 = sphi %s2077_s28, %s2612_s28   ;;  %s2002_s27 = sphi %s2075_s27, %s2611_s27   ;;  %s1998_s26 = sphi %s2073_s26, %s2610_s26   ;;  %s1994_s25 = sphi %s2071_s25, %s2609_s25   ;;  %s1990_s24 = sphi %s2069_s24, %s2608_s24  }
   0xd   : > { %p70_p0 = scmp.ne.s32.totalorder %s1994_s25, %s1990_s24  ;;  %p2103_p1 = scmp.eq.s32.totalorder %s1495_s30, 0 }
   0xe   : > { %p2107_p2 = scmp.eq.s32.totalorder %s1495_s30, 1  ;;  %p230_p3 = scmp.eq.s32.totalorder %s1496_s8, 1 }
   0xf   : > { %s2587_s9 = scalar_select %p2103_p1, 1, 0 }
  0x10   : > { %s2588_s10 = scalar_select %p2107_p2, 1, 0 }
  0x11   : > { %p2113_p4 = por %p2103_p1, %p70_p0  ;;  %p1497_p5 = scmp.ge.s32.totalorder %s2010_s29, 1 }
  0x12   : > { %p2118_p6 = por %p230_p3, %p70_p0  ;;  %p265_p7 = scmp.lt.s32.totalorder %s2010_s29, 3 }
  0x13   : > { %s2589_s11 = scalar_select %p2113_p4, 1, 0 }
  0x14   : > { %s2590_s12 = scalar_select %p2118_p6, 1, 0 }
  0x15   : > { %s1498_s13 = sshll.u32 %s2002_s27, 6  ;;  %p2124_p8 = pnand %p1497_p5, %p265_p7 }
  0x16   : > { %s2592_s1 = sld [smem:[#allocation21_spill]]  ;;  %s2012_s18 = smov [#allocation8]  }
  0x17   : > { %s2591_s14 = scalar_select %p2124_p8, 1, 0 }
  0x18   : > { %s281_s19 = sshll.u32 %s2012_s18, 4  ;;  %p2579_p9 = pneg %p2124_p8  ;;  %s2135_s19 = int_to_ptr.vmem [resolvable:$true] %s281_s19 }
  0x19   : > { %s2141_s22 = scalar_lea.hbm %s2573_s2, %s1498_s13  ;;  %s2013_s30 = smov [#allocation10]  }
  0x1a   : > { %p2148_p11 = pnand %p2579_p9, %p2113_p4  ;;  %s295_s8 = sshll.u32 %s2013_s30, 4  ;;  %s2152_s8 = int_to_ptr.vmem [resolvable:$true] %s295_s8 }
  0x1c   : > { %s2131_s17 = scalar_lea.hbm %s2592_s1, %s1498_s13  ;;  %p1772_p13 = pneg %p2148_p11 }
  0x1d   : > { %s1770_s15 = scalar_lea.hbm %s2131_s17, 64  ;;  %s1775_s18 = scalar_lea.hbm %s2592_s1, 128 }
  0x1e   : > { %p1771_p12 = scmp.ne.s32.totalorder %s2131_s17, %s1770_s15  ;;  %p1776_p5 = scmp.lt.u32.totalorder %s2131_s17, %s2592_s1 }
  0x1f   : > { %p1777_p7 = scmp.lt.u32.totalorder %s1775_s18, %s1770_s15  ;;  %p1779_p9 = scmp.lt.u32.totalorder %s1770_s15, %s2131_s17 }
  0x20   : > { %p1773_p0 = pnand %p1772_p13, %p1771_p12 }
  0x21   : > { %p1778_p10 = por %p1777_p7, %p1776_p5 }
  0x22   : > { %p1774_p3 = pneg %p1773_p0 }
  0x23   : > { %p1780_p6 = por %p1779_p9, %p1778_p10 }
  0x25   : > { %p1781_p4 = pnand %p1780_p6, %p1774_p3 }
  0x27   : > { %1784 = shalt.err (!%p1781_p4)
}
  0x28   : > { %s1785_s30 = scalar_lea.vmem %s2135_s19, 64  ;;  %p1793_p8 = scmp.lt.s32.totalorder %s2135_s19, %s2135_s19 }
  0x29   : > { %p1786_p12 = scmp.ne.s32.totalorder %s2135_s19, %s1785_s30  ;;  %p1794_p1 = scmp.lt.s32.totalorder %s1785_s30, %s1785_s30 }
  0x2b   : > { %p1788_p0 = pnand %p1786_p12, %p1772_p13  ;;  %p1795_p5 = por %p1794_p1, %p1793_p8 }
  0x2d   : > { %p1789_p2 = pneg %p1788_p0 }
  0x2f   : > { %p1796_p7 = pnand %p1795_p5, %p1789_p2 }
  0x31   : > { %1799 = shalt.err (!%p1796_p7)
}
  0x32   : > { %1650 = dma.hbm_to_vmem [thread:$0]  (!%p2148_p11), %s2131_s17, 64, %s2135_s19, [#allocation9]  }
  0x33   : > { %s1800_s15 = scalar_lea.hbm %s2141_s22, 64  ;;  %s1805_s18 = scalar_lea.hbm %s2573_s2, 128 }
  0x34   : > { %p1801_p4 = scmp.ne.s32.totalorder %s2141_s22, %s1800_s15  ;;  %p1806_p1 = scmp.lt.u32.totalorder %s2141_s22, %s2573_s2 }
  0x35   : > { %p1807_p2 = scmp.lt.u32.totalorder %s1805_s18, %s1800_s15  ;;  %p1809_p10 = scmp.lt.u32.totalorder %s1800_s15, %s2141_s22 }
  0x36   : > { %p1803_p6 = pnand %p1801_p4, %p1772_p13 }
  0x37   : > { %p1808_p8 = por %p1807_p2, %p1806_p1 }
  0x38   : > { %p1804_p9 = pneg %p1803_p6 }
  0x39   : > { %p1810_p3 = por %p1809_p10, %p1808_p8 }
  0x3b   : > { %p1811_p12 = pnand %p1810_p3, %p1804_p9 }
  0x3d   : > { %1814 = shalt.err (!%p1811_p12)
}
  0x3e   : > { %s1815_s17 = scalar_lea.vmem %s2152_s8, 64  ;;  %p1823_p4 = scmp.lt.s32.totalorder %s2152_s8, %s2152_s8 }
  0x3f   : > { %p1816_p0 = scmp.ne.s32.totalorder %s2152_s8, %s1815_s17  ;;  %p1824_p6 = scmp.lt.s32.totalorder %s1815_s17, %s1815_s17 }
  0x41   : > { %p1818_p5 = pnand %p1816_p0, %p1772_p13  ;;  %p1825_p1 = por %p1824_p6, %p1823_p4 }
  0x43   : > { %p1819_p7 = pneg %p1818_p5 }
  0x45   : > { %p1826_p2 = pnand %p1825_p1, %p1819_p7 }
  0x47   : > { %1829 = shalt.err (!%p1826_p2)
}
  0x48   : > { %1653 = dma.hbm_to_vmem [thread:$0]  (!%p2148_p11), %s2141_s22, 64, %s2152_s8, [#allocation9]  }
  0x49   : > { %s2014_s19 = smov [#allocation11]   ;;  %p2594_p9 = scmp.ne.s32.totalorder %s2587_s9, 0 }
  0x4a   : > { %s305_s30 = sshll.u32 %s2014_s19, 4  ;;  %p2595_p8 = scmp.ne.s32.totalorder %s2591_s14, 0  ;;  %s306_s30 = int_to_ptr.vmem [resolvable:$true] %s305_s30 }
  0x4b   : > { %s1830_s23 = scalar_lea.hbm %s2575_s4, 256 }
  0x4c   : > { %p2596_p10 = pneg %p2595_p8  ;;  %p1831_p3 = scmp.ne.s32.totalorder %s2575_s4, %s1830_s23 }
  0x4d   : > { %p1837_p5 = scmp.lt.u32.totalorder %s1830_s23, %s2575_s4 }
  0x4e   : > { %p2209_p13 = pnand %p2596_p10, %p2594_p9 }
  0x50   : > { %p1832_p11 = pneg %p2209_p13 }
  0x52   : > { %p1833_p12 = pnand %p1832_p11, %p1831_p3 }
  0x54   : > { %p1834_p0 = pneg %p1833_p12 }
  0x56   : > { %p1839_p7 = pnand %p1837_p5, %p1834_p0 }
  0x58   : > { %1842 = shalt.err (!%p1839_p7)
}
  0x59   : > { %s1843_s21 = scalar_lea.vmem %s306_s30, 256  ;;  %p1851_p2 = scmp.lt.s32.totalorder %s306_s30, %s306_s30 }
  0x5a   : > { %p1844_p4 = scmp.ne.s32.totalorder %s306_s30, %s1843_s21  ;;  %p1852_p9 = scmp.lt.s32.totalorder %s1843_s21, %s1843_s21 }
  0x5c   : > { %p1846_p6 = pnand %p1844_p4, %p1832_p11  ;;  %p1853_p10 = por %p1852_p9, %p1851_p2 }
  0x5e   : > { %p1847_p1 = pneg %p1846_p6 }
  0x60   : > { %p1854_p8 = pnand %p1853_p10, %p1847_p1 }
  0x62   : > { %1857 = shalt.err (!%p1854_p8)
}
  0x63   : > { %s2015_s17 = smov 64   ;;  %s2016_s19 = smov 4  }
  0x64   : > { %1656 = dma.hbm_to_vmem [thread:$0]  (!%p2209_p13), %s2575_s4, 256, %s306_s30, [#allocation12], %s2015_s17, %s2015_s17, %s2016_s19  }
  0x65   : > { %s48_s23 = sadd.s32 1, %s2006_s28  ;;  %s57_s18 = sadd.s32 1, %s1998_s26 }
  0x66   : > { %p50_p8 = scmp.ge.s32.totalorder %s48_s23, 2  ;;  %p64_p3 = scmp.ne.s32.totalorder %s1998_s26, %s1994_s25 }
  0x67   : > { %p65_p11 = scmp.eq.s32.totalorder %s2010_s29, 0  ;;  %p1669_p12 = scmp.lt.s32.totalorder %s2010_s29, 2 }
  0x68   : > { %s2614_s23 = smov (%p50_p8, %s48_s23), 0  ;;  %p2598_p5 = scmp.ne.s32.totalorder %s2588_s10, 0 }
  0x69   : > { %p66_p0 = por %p65_p11, %p64_p3  ;;  %s52_s15 = ssub.s32 %s2006_s28, %s2614_s23 }
  0x6a   : > { %p2239_p7 = por %p2598_p5, %p64_p3  ;;  %s322_s22 = sand.u32 1, %s1998_s26  }
  0x6b   : > { %p55_p4 = scmp.eq.s32.totalorder %s52_s15, 0  ;;  %s1502_s30 = sshll.u32 %s322_s22, 2 }
  0x6c   : > { %s1503_s8 = sshll.u32 %s2006_s28, 6  ;;  %s326_s10 = scalar_lea.vmem [#allocation5], %s1502_s30 }
  0x6d   : > { %s2248_s21 = scalar_select %p55_p4, %s1998_s26, %s57_s18  }
  0x6e   : > { %s2253_s13 = scalar_lea.hbm %s2571_s0, %s1503_s8  ;;  %s334_s16 = sshll.u32 %s326_s10, 4  ;;  %s2261_s16 = int_to_ptr.vmem [resolvable:$true] %s334_s16 }
  0x6f   : > { %p2257_p13 = pnand %p1669_p12, %p66_p0  ;;  %s323_s18 = scalar_lea.sflag [#allocation6], %s322_s22 }
  0x70   : > { %s1858_s15 = scalar_lea.hbm %s2253_s13, 64  ;;  %s1863_s17 = scalar_lea.hbm %s2571_s0, 128 }
  0x71   : > { %p1859_p6 = scmp.ne.s32.totalorder %s2253_s13, %s1858_s15  ;;  %p1860_p1 = pneg %p2257_p13 }
  0x72   : > { %p1864_p10 = scmp.lt.u32.totalorder %s2253_s13, %s2571_s0  ;;  %p1865_p8 = scmp.lt.u32.totalorder %s1863_s17, %s1858_s15 }
  0x73   : > { %p1861_p2 = pnand %p1860_p1, %p1859_p6  ;;  %p1867_p11 = scmp.lt.u32.totalorder %s1858_s15, %s2253_s13 }
  0x74   : > { %p1866_p3 = por %p1865_p8, %p1864_p10 }
  0x75   : > { %p1862_p9 = pneg %p1861_p2 }
  0x76   : > { %p1868_p12 = por %p1867_p11, %p1866_p3 }
  0x78   : > { %p1869_p0 = pnand %p1868_p12, %p1862_p9 }
  0x7a   : > { %1872 = shalt.err (!%p1869_p0)
}
  0x7b   : > { %s1873_s22 = scalar_lea.vmem %s2261_s16, 64  ;;  %s2017_s30 = smov [#allocation5]  }
  0x7c   : > { %p1874_p5 = scmp.ne.s32.totalorder %s2261_s16, %s1873_s22  ;;  %s1878_s8 = sshll.u32 %s2017_s30, 4  ;;  %s1879_s8 = int_to_ptr.vmem [resolvable:$false] %s1878_s8 }
  0x7d   : > { %s1880_s19 = scalar_lea.vmem %s1879_s8, 128  ;;  %p1881_p2 = scmp.lt.s32.totalorder %s2261_s16, %s1879_s8 }
  0x7e   : > { %p1876_p4 = pnand %p1874_p5, %p1860_p1  ;;  %p1882_p10 = scmp.lt.s32.totalorder %s1880_s19, %s1873_s22 }
  0x80   : > { %p1877_p6 = pneg %p1876_p4  ;;  %p1883_p8 = por %p1882_p10, %p1881_p2 }
  0x82   : > { %p1884_p3 = pnand %p1883_p8, %p1877_p6 }
  0x84   : > { %1887 = shalt.err (!%p1884_p3)
}
  0x85   : > { %1660 = dma.hbm_to_vmem [thread:$0]  (!%p2257_p13), %s2253_s13, 64, %s2261_s16, %s323_s18  }
  0x86   : > { %p2601_p9 = scmp.ne.s32.totalorder %s2591_s14, 0 }
  0x87   : > { %s2291_s15 = sand.u32 (!%p2601_p9), 1, %s1994_s25   ;;  %p2602_p1 = scmp.ne.s32.totalorder (!%p2601_p9), %s2589_s11, 0 }
  0x88   : > { %356 = sbr.rel (%p2601_p9) target bundleno = 1713 (0x6b1), region = 44  ;;  %s1505_s17 = sshll.u32 (!%p2601_p9), %s2291_s15, 2 }
  0x89   : > { %s359_s10 = scalar_lea.sflag (!%p2601_p9), [#allocation6], %s2291_s15  ;;  %s362_s22 = scalar_lea.vmem (!%p2601_p9), [#allocation5], %s1505_s17 }
  0x8f   : > { %1969 = dma.done.wait (%p2602_p1), %s359_s10, 64  }
  0x90   : > { %1971 = vsyncadd (%p2602_p1), %s359_s10, 4294967232 }
  0x91   : > { %1973 = dma.done.wait (%p2602_p1), [#allocation9], 128  }
  0x92   : > { %1975 = vsyncadd (%p2602_p1), [#allocation9], 4294967168  ;;  %p2603_p13 = scmp.ne.s32.totalorder %s2587_s9, 0 }
  0x94   : > { %1977 = dma.done.wait (%p2603_p13), [#allocation12], 256  }
  0x95   : > { %1979 = vsyncadd (%p2603_p13), [#allocation12], 4294967040  ;;  %vm444_vm0 = vcmask 64512   ;;  %v2018_v0 = vmov 0.0   ;;  %vm2019_vm1 = vmmov 0   ;;  %vm435_vm2 = vcmask 7168  }
  0x96   : > { %1561 = vmatprep.subr.bf16.mxu0 %v2018_v0  ;;  %445 = vst.msk [vmem:[#allocation4] sm:$0xff] %vm444_vm0, %v2018_v0  ;;  %446 = vst.msk [vmem:[#allocation4 + $0x8] sm:$0xff] %vm444_vm0, %v2018_v0  ;;  %1563 = vmatprep.mubr.msk.bf16.mxu0 %vm2019_vm1, %v2018_v0  ;;  %v450_v1 = vld [vmem:[#allocation8] sm:$0xf]  ;;  %v449_v3 = vld [vmem:[%s362_s22] sm:$0xf] }
  0x97   : > { %447 = vst.msk [vmem:[#allocation4 + $0x10] sm:$0xff] %vm444_vm0, %v2018_v0  ;;  %448 = vst.msk [vmem:[#allocation4 + $0x18] sm:$0xff] %vm444_vm0, %v2018_v0  ;;  %1567 = vmatprep.subr.bf16.mxu1 %v2018_v0  ;;  %1569 = vmatprep.mubr.msk.bf16.mxu1 %vm2019_vm1, %v2018_v0  ;;  %v460_v2 = vsel %vm444_vm0, %v450_v1, 0  ;;  %v2020_v4 = vmov -inf   ;;  %p420_p11 = scmp.lt.s32.totalorder %s2002_s27, 1  ;;  %v2021_v14 = vmov 0   ;;  %v1513_v15 = vcombine.low %v450_v1, %v450_v1 }
  0x98   : > { %1562 = vmatpush3.bf16.xpose.msra.mxu0 %v460_v2  ;;  %436 = vst.msk [vmem:[#allocation2] sm:$0xff] %vm435_vm2, %v2020_v4  ;;  %437 = vst.msk [vmem:[#allocation2 + $0x8] sm:$0xff] %vm435_vm2, %v2020_v4  ;;  %1734 = vset.pattern.permute.xlu0 %v2021_v14  ;;  %s2022_s16 = smov 120   ;;  %v1512_v16 = vcombine.low %v449_v3, %v449_v3  ;;  %s2023_s18 = smov 112   ;;  %v2366_v21 = vld [vmem:[#allocation10] sm:$0xf] }
  0x99   : > { %1579 = vmatprep.subr.bf16.mxu0 %v2018_v0  ;;  %438 = vst.msk [vmem:[#allocation2 + $0x10] sm:$0xff] %vm435_vm2, %v2020_v4  ;;  %439 = vst.msk [vmem:[#allocation2 + $0x18] sm:$0xff] %vm435_vm2, %v2020_v4  ;;  %s421_s1 = scalar_select %p420_p11, %s2002_s27, 1  ;;  %1735 = vset.pattern.permute.xlu1 %v2021_v14  ;;  %vm538_vm4 = vcmask 1043456   ;;  %v1515_v7 = vcombine.low %v2366_v21, %v2366_v21  ;;  %vm593_vm5 = vcmask 60416  }
  0x9a   : > { %440 = vst.msk [vmem:[#allocation3] sm:$0xff] %vm435_vm2, %v2018_v0  ;;  %441 = vst.msk [vmem:[#allocation3 + $0x8] sm:$0xff] %vm435_vm2, %v2018_v0  ;;  %603 = vrot.lane.b32.xlu1 %v1513_v15, %s2022_s16  ;;  %s2024_s30 = smov 104   ;;  %v540_v22 = vsel %vm538_vm4, %v2366_v21, 0  ;;  %s1508_s8 = sshll.u32 %s2291_s15, 4 }
  0x9b   : > { %442 = vst.msk [vmem:[#allocation3 + $0x10] sm:$0xff] %vm435_vm2, %v2018_v0  ;;  %443 = vst.msk [vmem:[#allocation3 + $0x18] sm:$0xff] %vm435_vm2, %v2018_v0  ;;  %s1509_s9 = sshll.u32 %s421_s1, 1  ;;  %1568 = vmatpush3.bf16.msra.mxu1 %v540_v22  ;;  %s419_s19 = scalar_lea.vmem [#allocation14], %s1508_s8 }
  0x9c   : > { %s429_s13 = scalar_lea.vmem %s2574_s3, %s1509_s9  ;;  %1573 = vmatprep.subr.bf16.mxu1 %v2018_v0  ;;  %s1322_s17 = sshll.u32 %s419_s19, 4  ;;  %s2482_s17 = int_to_ptr.vmem [resolvable:$true] %s1322_s17 }
  0x9d   : > { %v452_v5 = vld [vmem:[%s429_s13] sm:$0x3]  ;;  %s1536_s10 = sshll.u32 %s2002_s27, 8  ;;  %s1294_s11 = scalar_lea.sflag [#allocation15], %s2291_s15 }
  0x9e   : > { %v453_v6 = vunpack.c.0.s8 %v452_v5  ;;  %598 = vrot.lane.b32.xlu1 %v1512_v16, %s2022_s16  ;;  %s2488_s9 = scalar_lea.hbm %s2578_s7, %s1536_s10  ;;  %s1888_s14 = scalar_lea.vmem %s2482_s17, 256 }
  0x9f   : > { %1564 = vmatmul.mubr.msk.bf16.vlgmr.msra.gmra.mrb[0].mxu0 %vm444_vm0, %v449_v3  ;;  %v2356_v17 = vld [vmem:[#allocation2] sm:$0xff]  ;;  %v653_v59 = vld [vmem:[#allocation2 + $0x8] sm:$0xff]  ;;  %p1889_p12 = scmp.ne.s32.totalorder %s2482_s17, %s1888_s14  ;;  %s2025_s13 = smov [#allocation14]  }
  0xa0   : > { %1581 = vmatprep.mubr.msk.bf16.mxu0 %vm2019_vm1, %v2018_v0  ;;  %vm2343_vm3 = vcmp.eq.s32.totalorder %v453_v6, 0  ;;  %v802_v63 = vld [vmem:[#allocation2 + $0x10] sm:$0xff]  ;;  %v948_v4 = vld [vmem:[#allocation2 + $0x18] sm:$0xff] }
  0xa1   : > { %p1890_p0 = pnand %p1889_p12, %p2239_p7 }
  0xa2   : > { %752 = vrot.lane.b32.xlu1 %v1513_v15, %s2023_s18 }
  0xa3   : > { %p1891_p5 = pneg %p1890_p0 }
  0xa6   : > { %750 = vrot.lane.b32.xlu1 %v1512_v16, %s2023_s18 }
  0xaa   : > { %898 = vrot.lane.b32.xlu1 %v1513_v15, %s2024_s30 }
  0xae   : > { %896 = vrot.lane.b32.xlu1 %v1512_v16, %s2024_s30 }
 0x10c   : > { %v604_v26 = vpop.permute.xlu1 %603 }
 0x10d   : > { %v609_v29 = vsel %vm444_vm0, %v604_v26, 0 }
 0x110   : > { %v599_v27 = vpop.permute.xlu1 %598 }
 0x114   : > { %v753_v31 = vpop.permute.xlu1 %752 }
 0x115   : > { %v758_v33 = vsel %vm444_vm0, %v753_v31, 0 }
 0x118   : > { %v751_v32 = vpop.permute.xlu1 %750 }
 0x11c   : > { %v899_v34 = vpop.permute.xlu1 %898 }
 0x11d   : > { %v904_v35 = vsel %vm444_vm0, %v899_v34, 0 }
 0x120   : > { %v897_v36 = vpop.permute.xlu1 %896 }
 0x172   : > { %v496_v8 = vpop.f32.mrb[0].mxu0 }
 0x173   : > { %v502_v9 = vsel %vm2343_vm3, -1e+20, %v496_v8  ;;  %v1565_v10 = vpop.f32.mrb[1].mxu0 }
 0x174   : > { %v499_v11 = vpop.f32.mrb[2].mxu0  ;;  %v504_v12 = vsel %vm444_vm0, %v502_v9, -inf }
 0x175   : > { %505 = vmax.xlane.f32.xlu0 %v504_v12  ;;  %v1566_v13 = vpop.f32.mrb[3].mxu0 }
 0x202   : > { %v506_v18 = vpop.xlane.xlu0 %505 }
 0x203   : > { %v2359_v19 = vmax.f32 %v2356_v17, %v506_v18 }
 0x205   : > { %v508_v20 = vsub.f32 %v2356_v17, %v2359_v19  ;;  %584 = vst.msk [vmem:[#allocation2] sm:$0xff] %vm435_vm2, %v2359_v19  ;;  %513 = vperm.xlu0 %1734, %v2359_v19   ;;  %v519_v19 = vld [vmem:[#allocation3] sm:$0xff] }
 0x284   : > { %v514_v23 = vpop.permute.xlu0 %513 }
 0x285   : > { %v516_v24 = vsub.f32 %v502_v9, %v514_v23 }
 0x287   : > { %v517_v25 = vmul.f32 1.442695, %v516_v24 }
 0x289   : > { %1738 = vpow2.f32 %v517_v25 }
 0x293   : > { %v2371_v28 = vpop.eup %1738 }
 0x294   : > { %v534_v30 = vpack.c.bf16 %v2371_v28, %v2371_v28  ;;  %v521_v9 = vsel %vm444_vm0, %v2371_v28, 0.0 }
 0x296   : > { %1570 = vmatmul.mubr.msk.bf16.vlgmr.msra.gmra.mrb[0].mxu1 %vm444_vm0, %v534_v30 }
 0x297   : > { %1574 = vmatpush3.bf16.xpose.msra.mxu1 %v609_v29  ;;  %1575 = vmatprep.mubr.msk.bf16.mxu1 %vm2019_vm1, %v2018_v0 }
 0x298   : > { %1585 = vmatprep.subr.bf16.mxu1 %v2018_v0 }
 0x29e   : > { %1576 = vmatmul.mubr.msk.bf16.vlgmr.msra.gmra.mrb[4].mxu1 %vm444_vm0, %v599_v27 }
 0x29f   : > { %1586 = vmatpush3.bf16.xpose.msra.mxu1 %v758_v33  ;;  %1587 = vmatprep.mubr.msk.bf16.mxu1 %vm2019_vm1, %v2018_v0 }
 0x2a0   : > { %1597 = vmatprep.subr.bf16.mxu1 %v2018_v0 }
 0x2a6   : > { %1588 = vmatmul.mubr.msk.bf16.vlgmr.msra.gmra.mrb[8].mxu1 %vm444_vm0, %v751_v32 }
 0x2a7   : > { %1598 = vmatpush3.bf16.xpose.msra.mxu1 %v904_v35  ;;  %1599 = vmatprep.mubr.msk.bf16.mxu1 %vm2019_vm1, %v2018_v0 }
 0x2a8   : > { %1609 = vmatprep.subr.bf16.mxu1 %v2018_v0 }
 0x2ae   : > { %1600 = vmatmul.mubr.msk.bf16.vlgmr.msra.gmra.mrb[12].mxu1 %vm444_vm0, %v897_v36 }
 0x2af   : > { %1611 = vmatprep.mubr.msk.bf16.mxu1 %vm2019_vm1, %v2018_v0 }
 0x369   : > { %v2393_v37 = vpop.f32.mrb[0].mxu1 }
 0x36a   : > { %v1571_v38 = vpop.f32.mrb[1].mxu1 }
 0x36b   : > { %v579_v39 = vpop.f32.mrb[2].mxu1 }
 0x36c   : > { %v1572_v40 = vpop.f32.mrb[3].mxu1  ;;  %v509_v39 = vmul.f32 1.442695, %v508_v20 }
 0x371   : > { %v645_v41 = vpop.f32.mrb[4].mxu1 }
 0x372   : > { %v651_v42 = vsel %vm2343_vm3, -1e+20, %v645_v41  ;;  %v1577_v43 = vpop.f32.mrb[5].mxu1 }
 0x373   : > { %v648_v44 = vpop.f32.mrb[6].mxu1  ;;  %v654_v45 = vsel %vm444_vm0, %v651_v42, -inf }
 0x374   : > { %655 = vmax.xlane.f32.xlu1 %v654_v45  ;;  %v1578_v46 = vpop.f32.mrb[7].mxu1 }
 0x379   : > { %v794_v47 = vpop.f32.mrb[8].mxu1 }
 0x37a   : > { %v800_v48 = vsel %vm2343_vm3, -1e+20, %v794_v47  ;;  %v1589_v49 = vpop.f32.mrb[9].mxu1 }
 0x37b   : > { %v797_v50 = vpop.f32.mrb[10].mxu1  ;;  %v803_v51 = vsel %vm444_vm0, %v800_v48, -inf }
 0x37c   : > { %804 = vmax.xlane.f32.xlu0 %v803_v51  ;;  %v1590_v52 = vpop.f32.mrb[11].mxu1  ;;  %v1055_v50 = vld [vmem:[#allocation11] sm:$0xf] }
 0x37d   : > { %v1118_v51 = vsel %vm538_vm4, %v1055_v50, 0  ;;  %v670_v52 = vld [vmem:[#allocation3 + $0x8] sm:$0xff] }
 0x381   : > { %v940_v53 = vpop.f32.mrb[12].mxu1 }
 0x382   : > { %v946_v54 = vsel %vm2343_vm3, -1e+20, %v940_v53  ;;  %v1601_v55 = vpop.f32.mrb[13].mxu1 }
 0x383   : > { %v943_v56 = vpop.f32.mrb[14].mxu1  ;;  %v949_v57 = vsel %vm444_vm0, %v946_v54, -inf }
 0x384   : > { %950 = vmax.xlane.f32.xlu1 %v949_v57  ;;  %v1602_v58 = vpop.f32.mrb[15].mxu1  ;;  %v819_v56 = vld [vmem:[#allocation3 + $0x10] sm:$0xff] }
 0x401   : > { %v656_v60 = vpop.xlane.xlu1 %655 }
 0x402   : > { %v657_v61 = vmax.f32 %v653_v59, %v656_v60 }
 0x404   : > { %v658_v62 = vsub.f32 %v653_v59, %v657_v61  ;;  %739 = vst.msk [vmem:[#allocation2 + $0x8] sm:$0xff] %vm435_vm2, %v657_v61  ;;  %663 = vperm.xlu1 %1735, %v657_v61   ;;  %v965_v61 = vld [vmem:[#allocation3 + $0x18] sm:$0xff] }
 0x406   : > { %v659_v36 = vmul.f32 1.442695, %v658_v62 }
 0x409   : > { %v805_v1 = vpop.xlane.xlu0 %804 }
 0x40a   : > { %v806_v2 = vmax.f32 %v802_v63, %v805_v1 }
 0x40c   : > { %v807_v3 = vsub.f32 %v802_v63, %v806_v2  ;;  %885 = vst.msk [vmem:[#allocation2 + $0x10] sm:$0xff] %vm435_vm2, %v806_v2  ;;  %812 = vperm.xlu0 %1734, %v806_v2   ;;  %v527_v2 = vld [vmem:[#allocation4] sm:$0xff] }
 0x40e   : > { %v808_v41 = vmul.f32 1.442695, %v807_v3 }
 0x411   : > { %v951_v5 = vpop.xlane.xlu1 %950 }
 0x412   : > { %v952_v6 = vmax.f32 %v948_v4, %v951_v5 }
 0x414   : > { %v953_v8 = vsub.f32 %v948_v4, %v952_v6  ;;  %1031 = vst.msk [vmem:[#allocation2 + $0x18] sm:$0xff] %vm435_vm2, %v952_v6  ;;  %958 = vperm.xlu1 %1735, %v952_v6  }
 0x416   : > { %v954_v40 = vmul.f32 1.442695, %v953_v8 }
 0x418   : > { %689 = vrot.lane.b32.xlu1 %v1515_v7, %s2022_s16  ;;  %s1892_s16 = sshll.u32 %s2025_s13, 4  ;;  %s1893_s16 = int_to_ptr.vmem [resolvable:$false] %s1892_s16 }
 0x419   : > { %p1895_p4 = scmp.lt.s32.totalorder %s2482_s17, %s1893_s16 }
 0x41c   : > { %835 = vrot.lane.b32.xlu1 %v1515_v7, %s2023_s18  ;;  %s1894_s18 = scalar_lea.vmem %s1893_s16, 512 }
 0x41d   : > { %p1896_p6 = scmp.lt.s32.totalorder %s1894_s18, %s1888_s14 }
 0x41f   : > { %p1897_p2 = por %p1896_p6, %p1895_p4 }
 0x420   : > { %981 = vrot.lane.b32.xlu1 %v1515_v7, %s2024_s30  ;;  %v1067_v7 = vld [vmem:[#allocation11 + $0x4] sm:$0xf] }
 0x421   : > { %p1898_p10 = pnand %p1897_p2, %p1891_p5 }
 0x42b   : > { %522 = vadd.xlane.f32.xlu0 %v521_v9  ;;  %v1072_v9 = vsel %vm538_vm4, %v1067_v7, 0 }
 0x42c   : > { %1610 = vmatpush3.bf16.msra.mxu1 %v1072_v9 }
 0x42d   : > { %1621 = vmatprep.subr.bf16.mxu1 %v2018_v0 }
 0x483   : > { %v664_v10 = vpop.permute.xlu1 %663 }
 0x484   : > { %v666_v11 = vsub.f32 %v651_v42, %v664_v10 }
 0x486   : > { %v667_v12 = vmul.f32 1.442695, %v666_v11 }
 0x488   : > { %1740 = vpow2.f32 %v667_v12 }
 0x48b   : > { %v813_v13 = vpop.permute.xlu0 %812 }
 0x48c   : > { %v815_v14 = vsub.f32 %v800_v48, %v813_v13 }
 0x48e   : > { %v816_v15 = vmul.f32 1.442695, %v815_v14 }
 0x490   : > { %1742 = vpow2.f32 %v816_v15 }
 0x492   : > { %v2414_v16 = vpop.eup %1740 }
 0x493   : > { %v959_v18 = vpop.permute.xlu1 %958  ;;  %v672_v21 = vsel %vm444_vm0, %v2414_v16, 0.0  ;;  %v685_v27 = vpack.c.bf16 %v2414_v16, %v2414_v16 }
 0x494   : > { %v961_v22 = vsub.f32 %v946_v54, %v959_v18  ;;  %673 = vadd.xlane.f32.xlu1 %v672_v21 }
 0x496   : > { %v962_v23 = vmul.f32 1.442695, %v961_v22 }
 0x497   : > { %v690_v24 = vpop.permute.xlu1 %689 }
 0x498   : > { %1744 = vpow2.f32 %v962_v23  ;;  %v695_v25 = vsel %vm538_vm4, %v690_v24, 0  ;;  %v1230_v23 = vld [vmem:[#allocation11 + $0xc] sm:$0xf] }
 0x499   : > { %1580 = vmatpush3.bf16.msra.mxu0 %v695_v25  ;;  %1746 = vpow2.f32 %v659_v36 }
 0x49a   : > { %v2419_v26 = vpop.eup %1742  ;;  %1591 = vmatprep.subr.bf16.mxu0 %v2018_v0  ;;  %1748 = vpow2.f32 %v509_v39  ;;  %v827_v39 = vld [vmem:[#allocation4 + $0x10] sm:$0xff] }
 0x49b   : > { %v821_v29 = vsel %vm444_vm0, %v2419_v26, 0.0  ;;  %v836_v30 = vpop.permute.xlu1 %835  ;;  %v834_v34 = vpack.c.bf16 %v2419_v26, %v2419_v26  ;;  %1750 = vpow2.f32 %v954_v40 }
 0x49c   : > { %1582 = vmatmul.mubr.msk.bf16.vlgmr.msra.gmra.mrb[4].mxu0 %vm444_vm0, %v685_v27  ;;  %822 = vadd.xlane.f32.xlu0 %v821_v29  ;;  %v841_v31 = vsel %vm538_vm4, %v836_v30, 0  ;;  %1752 = vpow2.f32 %v808_v41  ;;  %v1235_v29 = vsel %vm538_vm4, %v1230_v23, 0  ;;  %v678_v30 = vld [vmem:[#allocation4 + $0x8] sm:$0xff] }
 0x49d   : > { %1592 = vmatpush3.bf16.msra.mxu0 %v841_v31  ;;  %1593 = vmatprep.mubr.msk.bf16.mxu0 %vm2019_vm1, %v2018_v0 }
 0x49e   : > { %1603 = vmatprep.subr.bf16.mxu0 %v2018_v0 }
 0x49f   : > { %v982_v32 = vpop.permute.xlu1 %981 }
 0x4a0   : > { %v987_v35 = vsel %vm538_vm4, %v982_v32, 0 }
 0x4a2   : > { %v2431_v33 = vpop.eup %1744 }
 0x4a3   : > { %v967_v38 = vsel %vm444_vm0, %v2431_v33, 0.0  ;;  %v980_v42 = vpack.c.bf16 %v2431_v33, %v2431_v33  ;;  %v1747_v43 = vpop.eup %1746 }
 0x4a4   : > { %968 = vadd.xlane.f32.xlu1 %v967_v38  ;;  %1594 = vmatmul.mubr.msk.bf16.vlgmr.msra.gmra.mrb[8].mxu0 %vm444_vm0, %v834_v34  ;;  %v1749_v17 = vpop.eup %1748  ;;  %v671_v53 = vmul.f32 %v1747_v43, %v670_v52 }
 0x4a5   : > { %1604 = vmatpush3.bf16.msra.mxu0 %v987_v35  ;;  %1605 = vmatprep.mubr.msk.bf16.mxu0 %vm2019_vm1, %v2018_v0  ;;  %v1751_v20 = vpop.eup %1750  ;;  %v520_v44 = vmul.f32 %v1749_v17, %v519_v19 }
 0x4a6   : > { %1615 = vmatprep.subr.bf16.mxu0 %v2018_v0  ;;  %v1753_v45 = vpop.eup %1752  ;;  %v966_v62 = vmul.f32 %v1751_v20, %v965_v61 }
 0x4a7   : > { %v820_v57 = vmul.f32 %v1753_v45, %v819_v56 }
 0x4ac   : > { %1606 = vmatmul.mubr.msk.bf16.vlgmr.msra.gmra.mrb[12].mxu0 %vm444_vm0, %v980_v42 }
 0x4ad   : > { %1617 = vmatprep.mubr.msk.bf16.mxu0 %vm2019_vm1, %v2018_v0  ;;  %1616 = vmatpush3.bf16.msra.mxu0 %v1118_v51 }
 0x4ae   : > { %1627 = vmatprep.subr.bf16.mxu0 %v2018_v0 }
 0x4b2   : > { %681 = vperm.xlu0 %1734, %v1747_v43  }
 0x4b5   : > { %530 = vperm.xlu1 %1735, %v1749_v17  }
 0x4b6   : > { %976 = vperm.xlu0 %1734, %v1751_v20  }
 0x4b8   : > { %v523_v46 = vpop.xlane.xlu0 %522 }
 0x4b9   : > { %v524_v47 = vadd.f32 %v523_v46, %v520_v44  ;;  %830 = vperm.xlu1 %1735, %v1753_v45   ;;  %v973_v44 = vld [vmem:[#allocation4 + $0x18] sm:$0xff] }
 0x4bb   : > { %526 = vst.msk [vmem:[#allocation3] sm:$0xff] %vm435_vm2, %v524_v47 }
 0x4c2   : > { %v1046_v48 = vld [vmem:[#allocation3] sm:$0xff] }
 0x4c3   : > { %1754 = vrcp.f32 %v1046_v48 }
 0x4cd   : > { %v1755_v49 = vpop.eup %1754 }
 0x4ce   : > { %1050 = vperm.xlu0 %1734, %v1755_v49  }
 0x521   : > { %v674_v54 = vpop.xlane.xlu1 %673 }
 0x522   : > { %v675_v55 = vadd.f32 %v674_v54, %v671_v53  ;;  %v1171_v53 = vld [vmem:[#allocation11 + $0x8] sm:$0xf] }
 0x523   : > { %v1176_v56 = vsel %vm538_vm4, %v1171_v53, 0 }
 0x524   : > { %676 = vst.msk [vmem:[#allocation3 + $0x8] sm:$0xff] %vm435_vm2, %v675_v55 }
 0x529   : > { %v823_v58 = vpop.xlane.xlu0 %822 }
 0x52a   : > { %v824_v59 = vadd.f32 %v823_v58, %v820_v57 }
 0x52b   : > { %v1057_v60 = vld [vmem:[#allocation3 + $0x8] sm:$0xff] }
 0x52c   : > { %825 = vst.msk [vmem:[#allocation3 + $0x10] sm:$0xff] %vm435_vm2, %v824_v59  ;;  %1756 = vrcp.f32 %v1057_v60 }
 0x531   : > { %v969_v63 = vpop.xlane.xlu1 %968  ;;  %v682_v13 = vpop.permute.xlu0 %681 }
 0x532   : > { %v970_v1 = vadd.f32 %v969_v63, %v966_v62  ;;  %v684_v31 = vmul.f32 %v682_v13, %v678_v30 }
 0x533   : > { %v1161_v3 = vld [vmem:[#allocation3 + $0x10] sm:$0xff] }
 0x534   : > { %971 = vst.msk [vmem:[#allocation3 + $0x18] sm:$0xff] %vm435_vm2, %v970_v1  ;;  %1758 = vrcp.f32 %v1161_v3 }
 0x535   : > { %v531_v4 = vpop.permute.xlu1 %530  ;;  %1760 = vrcp.f32 %v524_v47  ;;  %v977_v15 = vpop.permute.xlu0 %976 }
 0x536   : > { %v533_v5 = vmul.f32 %v531_v4, %v527_v2  ;;  %v1757_v6 = vpop.eup %1756  ;;  %v979_v45 = vmul.f32 %v977_v15, %v973_v44 }
 0x537   : > { %1061 = vperm.xlu1 %1735, %v1757_v6  }
 0x538   : > { %v582_v8 = vadd.f32 %v2393_v37, %v533_v5 }
 0x539   : > { %v831_v40 = vpop.permute.xlu1 %830 }
 0x53a   : > { %583 = vst.msk [vmem:[#allocation4] sm:$0xff] %vm444_vm0, %v582_v8  ;;  %v833_v41 = vmul.f32 %v831_v40, %v827_v39 }
 0x53b   : > { %v1220_v10 = vld [vmem:[#allocation3 + $0x18] sm:$0xff] }
 0x53c   : > { %1762 = vrcp.f32 %v1220_v10 }
 0x53d   : > { %1764 = vrcp.f32 %v824_v59 }
 0x53e   : > { %v1759_v11 = vpop.eup %1758  ;;  %1766 = vrcp.f32 %v675_v55 }
 0x53f   : > { %1165 = vperm.xlu1 %1735, %v1759_v11   ;;  %v1761_v12 = vpop.eup %1760  ;;  %1768 = vrcp.f32 %v970_v1 }
 0x541   : > { %v1045_v21 = vld [vmem:[#allocation4] sm:$0xff] }
 0x543   : > { %588 = vperm.xlu1 %1735, %v1761_v12  }
 0x546   : > { %v1763_v37 = vpop.eup %1762 }
 0x547   : > { %v1765_v14 = vpop.eup %1764  ;;  %1224 = vperm.xlu0 %1734, %v1763_v37  }
 0x548   : > { %889 = vperm.xlu1 %1735, %v1765_v14   ;;  %v1767_v18 = vpop.eup %1766 }
 0x549   : > { %v1769_v24 = vpop.eup %1768 }
 0x54b   : > { %743 = vperm.xlu0 %1734, %v1767_v18  }
 0x54d   : > { %v1051_v22 = vpop.permute.xlu0 %1050 }
 0x54e   : > { %v1053_v25 = vmul.f32 %v1051_v22, %v1045_v21 }
 0x54f   : > { %1035 = vperm.xlu0 %1734, %v1769_v24  }
 0x550   : > { %v1054_v27 = vpack.c.bf16 %v1053_v25, %v1053_v25 }
 0x552   : > { %1618 = vmatmul.mubr.msk.bf16.vlgmr.msra.gmra.mrb[16].mxu0 %vm444_vm0, %v1054_v27 }
 0x553   : > { %1628 = vmatpush3.bf16.msra.mxu0 %v1235_v29  ;;  %1629 = vmatprep.mubr.msk.bf16.mxu0 %vm2019_vm1, %v2018_v0 }
 0x56f   : > { %v731_v32 = vpop.f32.mrb[4].mxu0 }
 0x570   : > { %v737_v34 = vadd.f32 %v731_v32, %v684_v31  ;;  %v1583_v35 = vpop.f32.mrb[5].mxu0 }
 0x571   : > { %v734_v36 = vpop.f32.mrb[6].mxu0 }
 0x572   : > { %738 = vst.msk [vmem:[#allocation4 + $0x8] sm:$0xff] %vm444_vm0, %v737_v34  ;;  %v1584_v38 = vpop.f32.mrb[7].mxu0 }
 0x577   : > { %v877_v42 = vpop.f32.mrb[8].mxu0 }
 0x578   : > { %v883_v43 = vadd.f32 %v877_v42, %v833_v41  ;;  %v1595_v17 = vpop.f32.mrb[9].mxu0 }
 0x579   : > { %v880_v19 = vpop.f32.mrb[10].mxu0  ;;  %v1056_v51 = vld [vmem:[#allocation4 + $0x8] sm:$0xff] }
 0x57a   : > { %884 = vst.msk [vmem:[#allocation4 + $0x10] sm:$0xff] %vm444_vm0, %v883_v43  ;;  %v1596_v20 = vpop.f32.mrb[11].mxu0 }
 0x57f   : > { %v1023_v46 = vpop.f32.mrb[12].mxu0 }
 0x580   : > { %v1029_v47 = vadd.f32 %v1023_v46, %v979_v45  ;;  %v1607_v48 = vpop.f32.mrb[13].mxu0 }
 0x581   : > { %v1026_v49 = vpop.f32.mrb[14].mxu0  ;;  %v1160_v57 = vld [vmem:[#allocation4 + $0x10] sm:$0xff] }
 0x582   : > { %1030 = vst.msk [vmem:[#allocation4 + $0x18] sm:$0xff] %vm444_vm0, %v1029_v47  ;;  %v1608_v50 = vpop.f32.mrb[15].mxu0 }
 0x589   : > { %v1219_v1 = vld [vmem:[#allocation4 + $0x18] sm:$0xff] }
 0x5b6   : > { %v1062_v52 = vpop.permute.xlu1 %1061 }
 0x5b7   : > { %v1064_v54 = vmul.f32 %v1062_v52, %v1056_v51 }
 0x5b9   : > { %v1065_v55 = vpack.c.bf16 %v1064_v54, %v1064_v54 }
 0x5bb   : > { %1612 = vmatmul.mubr.msk.bf16.vlgmr.msra.gmra.mrb[16].mxu1 %vm444_vm0, %v1065_v55 }
 0x5bc   : > { %1622 = vmatpush3.bf16.msra.mxu1 %v1176_v56  ;;  %1623 = vmatprep.mubr.msk.bf16.mxu1 %vm2019_vm1, %v2018_v0 }
 0x5be   : > { %v1166_v58 = vpop.permute.xlu1 %1165 }
 0x5bf   : > { %v1168_v59 = vmul.f32 %v1166_v58, %v1160_v57 }
 0x5c1   : > { %v1169_v60 = vpack.c.bf16 %v1168_v59, %v1168_v59 }
 0x5c2   : > { %v589_v61 = vpop.permute.xlu1 %588 }
 0x5c3   : > { %v591_v62 = vmul.f32 %v2371_v28, %v589_v61  ;;  %1624 = vmatmul.mubr.msk.bf16.vlgmr.msra.gmra.mrb[20].mxu1 %vm444_vm0, %v1169_v60 }
 0x5c5   : > { %v592_v63 = vpack.c.bf16 %v591_v62, %v591_v62 }
 0x5c6   : > { %v1225_v2 = vpop.permute.xlu0 %1224 }
 0x5c7   : > { %v890_v3 = vpop.permute.xlu1 %889  ;;  %v1227_v4 = vmul.f32 %v1225_v2, %v1219_v1  ;;  %594 = vst.msk [vmem:[%s419_s19] sm:$0xf] %vm593_vm5, %v592_v63 }
 0x5c8   : > { %v892_v0 = vmul.f32 %v2419_v26, %v890_v3 }
 0x5c9   : > { %v1228_v5 = vpack.c.bf16 %v1227_v4, %v1227_v4 }
 0x5ca   : > { %v893_v6 = vpack.c.bf16 %v892_v0, %v892_v0  ;;  %v744_v7 = vpop.permute.xlu0 %743 }
 0x5cb   : > { %v746_v8 = vmul.f32 %v2414_v16, %v744_v7  ;;  %1630 = vmatmul.mubr.msk.bf16.vlgmr.msra.gmra.mrb[20].mxu0 %vm444_vm0, %v1228_v5 }
 0x5cc   : > { %1520 = vst.msk [vmem:[%s419_s19 + $0x8] sm:$0xf] %vm593_vm5, %v893_v6 }
 0x5cd   : > { %v747_v28 = vpack.c.bf16 %v746_v8, %v746_v8 }
 0x5ce   : > { %v1036_v9 = vpop.permute.xlu0 %1035 }
 0x5cf   : > { %1517 = vst.msk [vmem:[%s419_s19 + $0x4] sm:$0xf] %vm593_vm5, %v747_v28  ;;  %v1038_v10 = vmul.f32 %v2431_v33, %v1036_v9 }
 0x5d1   : > { %v1039_v11 = vpack.c.bf16 %v1038_v10, %v1038_v10 }
 0x5d3   : > { %1523 = vst.msk [vmem:[%s419_s19 + $0xc] sm:$0xf] %vm593_vm5, %v1039_v11 }
 0x625   : > { %v1154_v16 = vpop.f32.mrb[16].mxu0 }
 0x626   : > { %v1619_v26 = vpop.f32.mrb[17].mxu0 }
 0x627   : > { %v1157_v12 = vpop.f32.mrb[18].mxu0 }
 0x628   : > { %v1620_v13 = vpop.f32.mrb[19].mxu0 }
 0x629   : > { %1901 = shalt.err (!%p1898_p10)
}
 0x62a   : > { %s1902_s30 = scalar_lea.hbm %s2488_s9, 256  ;;  %s1906_s10 = scalar_lea.hbm %s2578_s7, 512 }
 0x62b   : > { %p1903_p8 = scmp.ne.s32.totalorder %s2488_s9, %s1902_s30  ;;  %p1907_p1 = scmp.lt.u32.totalorder %s2488_s9, %s2578_s7 }
 0x62c   : > { %p1908_p13 = scmp.lt.u32.totalorder %s1906_s10, %s1902_s30  ;;  %p1910_p12 = scmp.lt.u32.totalorder %s1902_s30, %s2488_s9 }
 0x62d   : > { %p1904_p3 = pnand %p1903_p8, %p2239_p7 }
 0x62e   : > { %p1909_p11 = por %p1908_p13, %p1907_p1 }
 0x62f   : > { %p1905_p9 = pneg %p1904_p3 }
 0x630   : > { %p1911_p0 = por %p1910_p12, %p1909_p11 }
 0x632   : > { %p1912_p5 = pnand %p1911_p0, %p1905_p9 }
 0x634   : > { %1915 = shalt.err (!%p1912_p5)
}
 0x635   : > { %s2026_s14 = smov 64   ;;  %s2027_s13 = smov 4   ;;  %v1528_v29 = vld [vmem:[%s2576_s5] ss:$0 sm:$0xff]  ;;  %vm1286_vm6 = vcmask 261120  }
 0x636   : > { %1644 = dma.vmem_to_hbm [thread:$0]  (%p2239_p7), %s2482_s17, 256, %s2488_s9, %s1294_s11, %s2026_s14, %s2026_s14, %s2027_s13  }
 0x637   : > { %s1507_s16 = sshll.u32 %s2291_s15, 3  ;;  %s1531_s8 = sshll.u32 %s2002_s27, 7 }
 0x638   : > { %s412_s17 = scalar_lea.vmem [#allocation13], %s1507_s16  ;;  %s2522_s10 = scalar_lea.hbm %s2577_s6, %s1531_s8 }
 0x639   : > { %s1308_s9 = sshll.u32 %s412_s17, 4  ;;  %s1289_s27 = scalar_lea.sflag [#allocation7], %s2291_s15  ;;  %s2524_s9 = int_to_ptr.vmem [resolvable:$true] %s1308_s9 }
 0x63a   : > { %s1916_s22 = scalar_lea.vmem %s2524_s9, 128  ;;  %s2028_s1 = smov [#allocation13]  }
 0x63b   : > { %p1917_p4 = scmp.ne.s32.totalorder %s2524_s9, %s1916_s22  ;;  %s1920_s14 = sshll.u32 %s2028_s1, 4  ;;  %s1921_s14 = int_to_ptr.vmem [resolvable:$false] %s1920_s14 }
 0x63c   : > { %s1922_s13 = scalar_lea.vmem %s1921_s14, 256  ;;  %p1923_p10 = scmp.lt.s32.totalorder %s2524_s9, %s1921_s14 }
 0x63d   : > { %p1918_p6 = pnand %p1917_p4, %p2239_p7  ;;  %p1924_p8 = scmp.lt.s32.totalorder %s1922_s13, %s1916_s22 }
 0x63f   : > { %p1919_p2 = pneg %p1918_p6  ;;  %p1925_p3 = por %p1924_p8, %p1923_p10 }
 0x641   : > { %p1926_p9 = pnand %p1925_p3, %p1919_p2 }
 0x68e   : > { %v1108_v33 = vpop.f32.mrb[16].mxu1 }
 0x68f   : > { %v1155_v37 = vadd.f32 %v1154_v16, %v1108_v33  ;;  %v1613_v14 = vpop.f32.mrb[17].mxu1 }
 0x690   : > { %v1111_v15 = vpop.f32.mrb[18].mxu1 }
 0x691   : > { %v1614_v18 = vpop.f32.mrb[19].mxu1 }
 0x696   : > { %v1212_v21 = vpop.f32.mrb[20].mxu1 }
 0x697   : > { %v1218_v22 = vadd.f32 %v1212_v21, %v1155_v37  ;;  %v1625_v23 = vpop.f32.mrb[21].mxu1 }
 0x698   : > { %v1215_v24 = vpop.f32.mrb[22].mxu1 }
 0x699   : > { %v1626_v25 = vpop.f32.mrb[23].mxu1 }
 0x69e   : > { %v1271_v27 = vpop.f32.mrb[20].mxu0 }
 0x69f   : > { %v1277_v30 = vadd.f32 %v1271_v27, %v1218_v22  ;;  %v1631_v31 = vpop.f32.mrb[21].mxu0 }
 0x6a0   : > { %v1274_v32 = vpop.f32.mrb[22].mxu0 }
 0x6a1   : > { %v1285_v34 = vadd.f32 %v1528_v29, %v1277_v30  ;;  %v1632_v35 = vpop.f32.mrb[23].mxu0 }
 0x6a3   : > { %1287 = vst.msk [vmem:[%s412_s17] sm:$0xff] %vm1286_vm6, %v1285_v34 }
 0x6a4   : > { %1929 = shalt.err (!%p1926_p9)
}
 0x6a5   : > { %s1930_s15 = scalar_lea.hbm %s2522_s10, 128  ;;  %s1934_s30 = scalar_lea.hbm %s2577_s6, 256 }
 0x6a6   : > { %p1931_p1 = scmp.ne.s32.totalorder %s2522_s10, %s1930_s15  ;;  %p1935_p12 = scmp.lt.u32.totalorder %s2522_s10, %s2577_s6 }
 0x6a7   : > { %p1936_p0 = scmp.lt.u32.totalorder %s1934_s30, %s1930_s15  ;;  %p1938_p4 = scmp.lt.u32.totalorder %s1930_s15, %s2522_s10 }
 0x6a8   : > { %p1932_p13 = pnand %p1931_p1, %p2239_p7 }
 0x6a9   : > { %p1937_p5 = por %p1936_p0, %p1935_p12 }
 0x6aa   : > { %p1933_p11 = pneg %p1932_p13 }
 0x6ab   : > { %p1939_p6 = por %p1938_p4, %p1937_p5 }
 0x6ad   : > { %p1940_p2 = pnand %p1939_p6, %p1933_p11 }
 0x6af   : > { %1943 = shalt.err (!%p1940_p2)
}
 0x6b0   : > { %1643 = dma.vmem_to_hbm [thread:$0]  (%p2239_p7), %s2524_s9, 128, %s2522_s10, %s1289_s27  }
 0x6b1 PF: > { %s1337_s11 = sand.u32 1, %s1990_s24   ;;  %p2606_p10 = scmp.ne.s32.totalorder %s2590_s12, 0 }
 0x6b2   : > { %p2607_p8 = scmp.ge.s32.totalorder %s2010_s29, 2  ;;  %s1338_s19 = scalar_lea.sflag [#allocation7], %s1337_s11 }
 0x6b4   : > { %p1662_p3 = pnand %p2607_p8, %p2606_p10 }
 0x6b6   : > { %1981 = dma.done.wait (!%p1662_p3), %s1338_s19, 128  }
 0x6b7   : > { %1983 = vsyncadd (!%p1662_p3), %s1338_s19, 4294967168  ;;  %s1347_s22 = scalar_lea.sflag [#allocation15], %s1337_s11 }
 0x6b8   : > { %1985 = dma.done.wait (!%p1662_p3), %s1347_s22, 256  }
 0x6b9   : > { %1987 = vsyncadd (!%p1662_p3), %s1347_s22, 4294967040  ;;  %s29_s29 = sadd.s32 1, %s2010_s29   ;;  %s2608_s24 = smov %s1994_s25 }
 0x6ba   : > { %p26_p9 = scmp.ge.s32.totalorder %s29_s29, 4   ;;  %s2609_s25 = smov %s1998_s26 }
 0x6bb   : > { %s2610_s26 = smov %s2248_s21  ;;  %s2611_s27 = smov %s2006_s28 }
 0x6bc   : > { %s2612_s28 = smov %s2614_s23  ;;  %28 = sbr.rel (!%p26_p9) target bundleno = 12 (0xc), region = 146 }
 0x6c3   :  { %1352 = vsyncpa [#allocation6], 1 }
 0x6c4   :  { %1354 = vsyncpa [#allocation6 + $0x1], 1 }
 0x6c5   :  { %1355 = vsyncpa [#allocation9], 1 }
 0x6c6   :  { %1356 = vsyncpa [#allocation12], 1 }
 0x6c7   :  { %1357 = vsyncpa [#allocation7], 1 }
 0x6c8   :  { %1359 = vsyncpa [#allocation7 + $0x1], 1 }
 0x6c9   :  { %1360 = vsyncpa [#allocation15], 1 }
 0x6ca   :  { %1362 = vsyncpa [#allocation15 + $0x1], 1 }

</bundles_post_ra>
